<compile_context>
chip_gen: v6e
topology: v6e:2x2x1
jax: 0.10.0
libtpu: 0.0.40
codegen_flags: <defaults>
</compile_context>

<pallas_src>
import functools
import math

import jax
import jax.numpy as jnp
from jax.experimental import pallas as pl
from jax.experimental.pallas import tpu as pltpu


CFG = dict(
    vocab_size=100,
    type_vocab_size=2,
    max_position=16,
    hidden=32,
    num_heads=2,
    head_dim=16,
    intermediate=64,
    num_layers=2,
    num_intent_labels=5,
    num_slot_labels=7,
)

LANE = 128  # classifier heads / bias slab padded to a lane-dense 128 columns

# ---- packed-operand layout constants -------------------------------------
ROWS_PER_LAYER = 8                      # bqkv, bo, ln1_g, ln1_b, b1, b2, ln2_g, ln2_b
R_EMB_LN_G, R_EMB_LN_B = 0, 1
R_POOLER_B = 2 + CFG["num_layers"] * ROWS_PER_LAYER      # 18
R_INTENT_B = R_POOLER_B + 1
R_SLOT_B = R_POOLER_B + 2
VEC_ROWS = ((R_SLOT_B + 1 + 7) // 8) * 8                 # 24

WORD_ROWS = ((CFG["vocab_size"] + 7) // 8) * 8           # 104 (8-aligned)
POS_ROWS = CFG["max_position"]                           # 16
TOK_ROWS = 8                                             # type vocab padded to 8
EMB_TAB_ROWS = WORD_ROWS + POS_ROWS + TOK_ROWS           # 128


# ----------------------------------------------------------------------------
# Fused kernel
# ----------------------------------------------------------------------------

def _layernorm(x, g, b, eps=1e-12):
    mean = jnp.mean(x, axis=-1, keepdims=True)
    var = jnp.mean(jnp.square(x - mean), axis=-1, keepdims=True)
    return (x - mean) * jax.lax.rsqrt(var + eps) * g + b


def _jointbert_kernel(
    ids_ref, amask_ref, emb_tab_ref, vec_ref,
    wqkv_ref, wo_ref, w1_ref, w2_ref, epi_ref,
    intent_out_ref, slot_out_ref,
    *, batch, seq, num_layers, num_heads, head_dim, hidden, intermediate):
    """Single grid step: embeddings + full encoder + pooler + both heads."""
    BS = batch * seq
    HD = num_heads * head_dim           # == hidden
    QKV = 3 * HD
    neg = jnp.float32(-1e9)
    zero = jnp.float32(0.0)

    ids = ids_ref[...]                                    # [BS, 2] int32
    wid = ids[:, 0:1]                                     # word ids
    tid = ids[:, 1:2]                                     # token-type ids

    # ---- embeddings via one-hot matmuls against the VMEM-resident table ----
    word_iota = jax.lax.broadcasted_iota(jnp.int32, (BS, WORD_ROWS), 1)
    word_oh = (word_iota == wid).astype(jnp.float32)
    x = jnp.dot(word_oh, emb_tab_ref[0:WORD_ROWS, :],
                preferred_element_type=jnp.float32)       # [BS, H]

    # position one-hot: pos(t) = t mod seq, built from static per-batch compares
    t_i = jax.lax.broadcasted_iota(jnp.int32, (BS, seq), 0)
    p_i = jax.lax.broadcasted_iota(jnp.int32, (BS, seq), 1)
    pos_hit = None
    for b in range(batch):
        c = (t_i == p_i + b * seq)
        pos_hit = c if pos_hit is None else (pos_hit | c)
    x = x + jnp.dot(pos_hit.astype(jnp.float32),
                    emb_tab_ref[WORD_ROWS:WORD_ROWS + seq, :],
                    preferred_element_type=jnp.float32)

    tok_iota = jax.lax.broadcasted_iota(jnp.int32, (BS, TOK_ROWS), 1)
    tok_oh = (tok_iota == tid).astype(jnp.float32)
    x = x + jnp.dot(tok_oh,
                    emb_tab_ref[WORD_ROWS + POS_ROWS:WORD_ROWS + POS_ROWS + TOK_ROWS, :],
                    preferred_element_type=jnp.float32)

    x = _layernorm(x, vec_ref[R_EMB_LN_G:R_EMB_LN_G + 1, 0:hidden],
                   vec_ref[R_EMB_LN_B:R_EMB_LN_B + 1, 0:hidden])

    # ---- block-diagonal attention bias (no cross-sequence attention) +
    # ---- key-padding mask, built once and reused by every layer/head.
    kmask = (amask_ref[...] != 0)                          # [1, BS] bool
    ri = jax.lax.broadcasted_iota(jnp.int32, (BS, BS), 0)
    ci = jax.lax.broadcasted_iota(jnp.int32, (BS, BS), 1)
    same = None
    for b in range(batch):
        lo = b * seq
        blk = (ri >= lo) & (ri < lo + seq) & (ci >= lo) & (ci < lo + seq)
        same = blk if same is None else (same | blk)
    attn_bias = jnp.where(same & kmask, zero, neg)         # [BS, BS] f32

    # ---- transformer layers (statically unrolled) ----
    for l in range(num_layers):
        base = 2 + l * ROWS_PER_LAYER

        # fused Q/K/V projection: one [BS,H] x [H,3*nH*dH] matmul.
        # (1/sqrt(head_dim) is pre-folded into the Q section at pack time.)
        qkv = jnp.dot(x, wqkv_ref[l], preferred_element_type=jnp.float32) \
            + vec_ref[base + 0:base + 1, 0:QKV]
        q = qkv[:, 0:HD]
        k = qkv[:, HD:2 * HD]
        v = qkv[:, 2 * HD:3 * HD]

        ctx_heads = []
        for h in range(num_heads):
            sl = slice(h * head_dim, (h + 1) * head_dim)
            s = jax.lax.dot_general(q[:, sl], k[:, sl],
                                    (((1,), (1,)), ((), ())),
                                    preferred_element_type=jnp.float32)
            s = s + attn_bias
            s = s - jnp.max(s, axis=-1, keepdims=True)
            p = jnp.exp(s)
            p = p * pl.reciprocal(jnp.sum(p, axis=-1, keepdims=True), approx=True)
            ctx_heads.append(jnp.dot(p, v[:, sl],
                                     preferred_element_type=jnp.float32))
        ctx = jnp.concatenate(ctx_heads, axis=-1)           # [BS, nH*dH]

        attn_out = jnp.dot(ctx, wo_ref[l], preferred_element_type=jnp.float32) \
            + vec_ref[base + 1:base + 2, 0:hidden]
        x = _layernorm(x + attn_out,
                       vec_ref[base + 2:base + 3, 0:hidden],
                       vec_ref[base + 3:base + 4, 0:hidden])

        # feed-forward
        ff = jnp.dot(x, w1_ref[l], preferred_element_type=jnp.float32) \
            + vec_ref[base + 4:base + 5, 0:intermediate]
        # TODO(synk): PyTorch/HF BERT's "gelu" is the exact erf form; the tanh
        # approximation is used here for guaranteed Mosaic lowering.
        ff = jax.nn.gelu(ff, approximate=True)
        ff = jnp.dot(ff, w2_ref[l], preferred_element_type=jnp.float32) \
            + vec_ref[base + 5:base + 6, 0:hidden]
        x = _layernorm(x + ff,
                       vec_ref[base + 6:base + 7, 0:hidden],
                       vec_ref[base + 7:base + 8, 0:hidden])

    # ---- slot head on the whole token slab (lane-dense padded store) ----
    slot = jnp.dot(x, epi_ref[2 * hidden:3 * hidden, :],
                   preferred_element_type=jnp.float32) \
        + vec_ref[R_SLOT_B:R_SLOT_B + 1, :]
    slot_out_ref[...] = slot.astype(slot_out_ref.dtype)

    # ---- pooler (tanh on the B CLS rows) + intent head, batched over B ----
    bri = jax.lax.broadcasted_iota(jnp.int32, (batch, BS), 0)
    bci = jax.lax.broadcasted_iota(jnp.int32, (batch, BS), 1)
    sel = (bci == bri * seq).astype(jnp.float32)            # [B, BS] CLS selector
    cls = jnp.dot(sel, x, preferred_element_type=jnp.float32)        # [B, H]
    pooled = jnp.tanh(
        jnp.dot(cls, epi_ref[0:hidden, 0:hidden],
                preferred_element_type=jnp.float32)
        + vec_ref[R_POOLER_B:R_POOLER_B + 1, 0:hidden])
    intent = jnp.dot(pooled, epi_ref[hidden:2 * hidden, :],
                     preferred_element_type=jnp.float32) \
        + vec_ref[R_INTENT_B:R_INTENT_B + 1, :]
    intent_out_ref[...] = intent.astype(intent_out_ref.dtype)


# ----------------------------------------------------------------------------
# Parameters (deterministic small BERT-style encoder + JointBERT heads)
# ----------------------------------------------------------------------------

def init_params(key):
    H, I, L = CFG["hidden"], CFG["intermediate"], CFG["num_layers"]
    nH, dH = CFG["num_heads"], CFG["head_dim"]
    nI, nS = CFG["num_intent_labels"], CFG["num_slot_labels"]

    def nrm(k, shape, scale=0.02):
        return jax.random.normal(k, shape, jnp.float32) * scale

    keys = iter(jax.random.split(key, 24))
    return {
        "word_emb": nrm(next(keys), (CFG["vocab_size"], H)),
        "pos_emb": nrm(next(keys), (CFG["max_position"], H)),
        "tok_emb": nrm(next(keys), (CFG["type_vocab_size"], H)),
        "emb_ln_g": jnp.ones((H,), jnp.float32),
        "emb_ln_b": jnp.zeros((H,), jnp.float32),
        "wq": nrm(next(keys), (L, H, nH * dH)),
        "bq": jnp.zeros((L, nH * dH), jnp.float32),
        "wk": nrm(next(keys), (L, H, nH * dH)),
        "bk": jnp.zeros((L, nH * dH), jnp.float32),
        "wv": nrm(next(keys), (L, H, nH * dH)),
        "bv": jnp.zeros((L, nH * dH), jnp.float32),
        "wo": nrm(next(keys), (L, nH * dH, H)),
        "bo": jnp.zeros((L, H), jnp.float32),
        "ln1_g": jnp.ones((L, H), jnp.float32),
        "ln1_b": jnp.zeros((L, H), jnp.float32),
        "w1": nrm(next(keys), (L, H, I)),
        "b1": jnp.zeros((L, I), jnp.float32),
        "w2": nrm(next(keys), (L, I, H)),
        "b2": jnp.zeros((L, H), jnp.float32),
        "ln2_g": jnp.ones((L, H), jnp.float32),
        "ln2_b": jnp.zeros((L, H), jnp.float32),
        "pooler_w": nrm(next(keys), (H, H)),
        "pooler_b": jnp.zeros((H,), jnp.float32),
        "intent_w": nrm(next(keys), (H, nI)),
        "intent_b": jnp.zeros((nI,), jnp.float32),
        "slot_w": nrm(next(keys), (H, nS)),
        "slot_b": jnp.zeros((nS,), jnp.float32),
    }


def pack_params(p):
    """One-time packing: fused QKV weights (with 1/sqrt(dH) folded into Q),
    a single bias/LN vector slab, packed embedding tables and a packed
    pooler/intent/slot weight slab.  Runs once, outside the forward path."""
    H, I, L = CFG["hidden"], CFG["intermediate"], CFG["num_layers"]
    nH, dH = CFG["num_heads"], CFG["head_dim"]
    nI, nS = CFG["num_intent_labels"], CFG["num_slot_labels"]
    QKV = 3 * nH * dH
    scale = 1.0 / math.sqrt(dH)

    wqkv = jnp.concatenate([p["wq"] * scale, p["wk"], p["wv"]], axis=-1)  # [L,H,3HD]
    bqkv = jnp.concatenate([p["bq"] * scale, p["bk"], p["bv"]], axis=-1)  # [L,3HD]

    vec = jnp.zeros((VEC_ROWS, LANE), jnp.float32)
    vec = vec.at[R_EMB_LN_G, :H].set(p["emb_ln_g"])
    vec = vec.at[R_EMB_LN_B, :H].set(p["emb_ln_b"])
    for l in range(L):
        base = 2 + l * ROWS_PER_LAYER
        vec = vec.at[base + 0, :QKV].set(bqkv[l])
        vec = vec.at[base + 1, :H].set(p["bo"][l])
        vec = vec.at[base + 2, :H].set(p["ln1_g"][l])
        vec = vec.at[base + 3, :H].set(p["ln1_b"][l])
        vec = vec.at[base + 4, :I].set(p["b1"][l])
        vec = vec.at[base + 5, :H].set(p["b2"][l])
        vec = vec.at[base + 6, :H].set(p["ln2_g"][l])
        vec = vec.at[base + 7, :H].set(p["ln2_b"][l])
    vec = vec.at[R_POOLER_B, :H].set(p["pooler_b"])
    vec = vec.at[R_INTENT_B, :nI].set(p["intent_b"])
    vec = vec.at[R_SLOT_B, :nS].set(p["slot_b"])

    emb_tab = jnp.zeros((EMB_TAB_ROWS, H), jnp.float32)
    emb_tab = emb_tab.at[0:CFG["vocab_size"], :].set(p["word_emb"])
    emb_tab = emb_tab.at[WORD_ROWS:WORD_ROWS + CFG["max_position"], :].set(p["pos_emb"])
    emb_tab = emb_tab.at[WORD_ROWS + POS_ROWS:
                         WORD_ROWS + POS_ROWS + CFG["type_vocab_size"], :].set(p["tok_emb"])

    epi = jnp.zeros((3 * H, LANE), jnp.float32)
    epi = epi.at[0:H, 0:H].set(p["pooler_w"])
    epi = epi.at[H:2 * H, 0:nI].set(p["intent_w"])
    epi = epi.at[2 * H:3 * H, 0:nS].set(p["slot_w"])

    return dict(wqkv=wqkv, wo=p["wo"], w1=p["w1"], w2=p["w2"],
                vec=vec, emb_tab=emb_tab, epi=epi)


# ----------------------------------------------------------------------------
# Forward pass (one fused pallas_call, single grid step)
# ----------------------------------------------------------------------------

def joint_bert_forward(packed, input_ids, attention_mask, token_type_ids=None):
    B, S = input_ids.shape
    BS = B * S
    H, I, L = CFG["hidden"], CFG["intermediate"], CFG["num_layers"]
    nH, dH = CFG["num_heads"], CFG["head_dim"]
    nI, nS = CFG["num_intent_labels"], CFG["num_slot_labels"]
    QKV = 3 * nH * dH

    if token_type_ids is None:
        token_type_ids = jnp.zeros_like(input_ids)

    # Only trivial reshapes/packing in the wrapper; all compute is in-kernel.
    ids = jnp.stack([input_ids.reshape(BS).astype(jnp.int32),
                     token_type_ids.reshape(BS).astype(jnp.int32)], axis=-1)  # [BS, 2]
    amask = attention_mask.reshape(1, BS).astype(jnp.int32)                   # [1, BS]

    def full(shape):  # whole-array block, same block every (single) grid step
        zeros = (0,) * len(shape)
        return pl.BlockSpec(shape, lambda i, _z=zeros: _z)

    kernel = functools.partial(
        _jointbert_kernel,
        batch=B, seq=S, num_layers=L, num_heads=nH, head_dim=dH,
        hidden=H, intermediate=I)

    intent_out, slot_out = pl.pallas_call(
        kernel,
        grid=(1,),
        in_specs=[
            full((BS, 2)),                 # packed word / token-type ids
            full((1, BS)),                 # attention mask (int, converted in-kernel)
            full((EMB_TAB_ROWS, H)),       # packed embedding tables
            full((VEC_ROWS, LANE)),        # packed bias / LayerNorm vector slab
            full((L, H, QKV)),             # fused QKV weights
            full((L, nH * dH, H)),         # merged output projection
            full((L, H, I)),               # FFN w1
            full((L, I, H)),               # FFN w2
            full((3 * H, LANE)),           # pooler / intent / slot weight slab
        ],
        out_specs=(full((B, LANE)), full((BS, LANE))),
        out_shape=(jax.ShapeDtypeStruct((B, LANE), jnp.float32),
                   jax.ShapeDtypeStruct((BS, LANE), jnp.float32)),
        compiler_params=pltpu.CompilerParams(
            dimension_semantics=("arbitrary",),
        ),
    )(ids, amask, packed["emb_tab"], packed["vec"],
      packed["wqkv"], packed["wo"], packed["w1"], packed["w2"], packed["epi"])

    intent_logits = intent_out[:, :nI]                 # [B, num_intent_labels]
    slot_logits = slot_out[:, :nS].reshape(B, S, nS)   # [B, S, num_slot_labels]
    return intent_logits, slot_logits


# ----------------------------------------------------------------------------
# Main
# ----------------------------------------------------------------------------

if __name__ == "__main__":
    B, S = 2, 8
    key = jax.random.PRNGKey(0)
    k_param, k_ids = jax.random.split(key)

    params = init_params(k_param)
    packed = pack_params(params)          # one-time packing, hoisted out of forward
    jax.block_until_ready(packed)

    input_ids = jax.random.randint(k_ids, (B, S), 0, CFG["vocab_size"], dtype=jnp.int32)
    attention_mask = jnp.array(
        [[1, 1, 1, 1, 1, 1, 0, 0],
         [1, 1, 1, 1, 1, 1, 1, 1]], dtype=jnp.int32)
    token_type_ids = jnp.zeros((B, S), dtype=jnp.int32)

    intent_logits, slot_logits = joint_bert_forward(
        packed, input_ids, attention_mask, token_type_ids)
    jax.block_until_ready((intent_logits, slot_logits))

    assert intent_logits.shape == (B, CFG["num_intent_labels"])
    assert slot_logits.shape == (B, S, CFG["num_slot_labels"])
    assert bool(jnp.all(jnp.isfinite(intent_logits)))
    assert bool(jnp.all(jnp.isfinite(slot_logits)))
    print("KERNEL_OK")
</pallas_src>

<mosaic_0001>
module attributes {stable_mosaic.version = 11 : i64} {
  func.func @_jointbert_kernel(%arg0: i32, %arg1: memref<16x2xi32, #tpu.memory_space<vmem>>, %arg2: memref<1x16xi32, #tpu.memory_space<vmem>>, %arg3: memref<128x32xf32, #tpu.memory_space<vmem>>, %arg4: memref<24x128xf32, #tpu.memory_space<vmem>>, %arg5: memref<2x32x96xf32, #tpu.memory_space<vmem>>, %arg6: memref<2x32x32xf32, #tpu.memory_space<vmem>>, %arg7: memref<2x32x64xf32, #tpu.memory_space<vmem>>, %arg8: memref<2x64x32xf32, #tpu.memory_space<vmem>>, %arg9: memref<96x128xf32, #tpu.memory_space<vmem>>, %arg10: memref<2x128xf32, #tpu.memory_space<vmem>>, %arg11: memref<16x128xf32, #tpu.memory_space<vmem>>) attributes {dimension_semantics = [#tpu.dimension_semantics<arbitrary>], iteration_bounds = array<i64: 1>, scalar_prefetch = 0 : i64, scratch_operands = 0 : i64, tpu.core_type = #tpu.core_type<tc>, window_params = [{pipeline_mode = #tpu.pipeline_mode<synchronous>, transform_indices = @transform_0, window_bounds = array<i64: 16, 2>}, {pipeline_mode = #tpu.pipeline_mode<synchronous>, transform_indices = @transform_1, window_bounds = array<i64: 1, 16>}, {pipeline_mode = #tpu.pipeline_mode<synchronous>, transform_indices = @transform_2, window_bounds = array<i64: 128, 32>}, {pipeline_mode = #tpu.pipeline_mode<synchronous>, transform_indices = @transform_3, window_bounds = array<i64: 24, 128>}, {pipeline_mode = #tpu.pipeline_mode<synchronous>, transform_indices = @transform_4, window_bounds = array<i64: 2, 32, 96>}, {pipeline_mode = #tpu.pipeline_mode<synchronous>, transform_indices = @transform_5, window_bounds = array<i64: 2, 32, 32>}, {pipeline_mode = #tpu.pipeline_mode<synchronous>, transform_indices = @transform_6, window_bounds = array<i64: 2, 32, 64>}, {pipeline_mode = #tpu.pipeline_mode<synchronous>, transform_indices = @transform_7, window_bounds = array<i64: 2, 64, 32>}, {pipeline_mode = #tpu.pipeline_mode<synchronous>, transform_indices = @transform_8, window_bounds = array<i64: 96, 128>}, {pipeline_mode = #tpu.pipeline_mode<synchronous>, transform_indices = @transform_9, window_bounds = array<i64: 2, 128>}, {pipeline_mode = #tpu.pipeline_mode<synchronous>, transform_indices = @transform_10, window_bounds = array<i64: 16, 128>}]} {
    %c0 = arith.constant 0 : index
    %c0_0 = arith.constant 0 : index
    %0 = vector.load %arg1[%c0, %c0_0] : memref<16x2xi32, #tpu.memory_space<vmem>>, vector<16x2xi32>
    %1 = vector.extract_strided_slice %0 {offsets = [0, 0], sizes = [16, 1], strides = [1, 1]} : vector<16x2xi32> to vector<16x1xi32>
    %2 = vector.extract_strided_slice %0 {offsets = [0, 1], sizes = [16, 1], strides = [1, 1]} : vector<16x2xi32> to vector<16x1xi32>
    %3 = tpu.iota {dimensions = array<i32: 1>} : vector<16x104xi32>
    %4 = vector.broadcast %1 : vector<16x1xi32> to vector<16x104xi32>
    %5 = arith.cmpi eq, %3, %4 : vector<16x104xi32>
    %6 = arith.extui %5 : vector<16x104xi1> to vector<16x104xi32>
    %7 = arith.sitofp %6 : vector<16x104xi32> to vector<16x104xf32>
    %c0_1 = arith.constant 0 : index
    %c0_2 = arith.constant 0 : index
    %8 = vector.load %arg3[%c0_1, %c0_2] : memref<128x32xf32, #tpu.memory_space<vmem>>, vector<104x32xf32>
    %cst = arith.constant dense<0.000000e+00> : vector<16x32xf32>
    %9 = tpu.matmul %7, %8, %cst {dimension_numbers = #tpu.dot_dimension_numbers<[1], [0], [0], [1], [0, 0, 1, 1], [], []>} : vector<16x104xf32>, vector<104x32xf32>, vector<16x32xf32> -> vector<16x32xf32>
    %10 = tpu.iota {dimensions = array<i32: 0>} : vector<16x8xi32>
    %11 = tpu.iota {dimensions = array<i32: 1>} : vector<16x8xi32>
    %c0_i32 = arith.constant 0 : i32
    %12 = vector.broadcast %c0_i32 : i32 to vector<16x8xi32>
    %13 = arith.addi %11, %12 : vector<16x8xi32>
    %14 = arith.cmpi eq, %10, %13 : vector<16x8xi32>
    %c8_i32 = arith.constant 8 : i32
    %15 = vector.broadcast %c8_i32 : i32 to vector<16x8xi32>
    %16 = arith.addi %11, %15 : vector<16x8xi32>
    %17 = arith.cmpi eq, %10, %16 : vector<16x8xi32>
    %18 = arith.ori %14, %17 : vector<16x8xi1>
    %19 = arith.extui %18 : vector<16x8xi1> to vector<16x8xi32>
    %20 = arith.sitofp %19 : vector<16x8xi32> to vector<16x8xf32>
    %c104 = arith.constant 104 : index
    %c0_3 = arith.constant 0 : index
    %21 = vector.load %arg3[%c104, %c0_3] : memref<128x32xf32, #tpu.memory_space<vmem>>, vector<8x32xf32>
    %cst_4 = arith.constant dense<0.000000e+00> : vector<16x32xf32>
    %22 = tpu.matmul %20, %21, %cst_4 {dimension_numbers = #tpu.dot_dimension_numbers<[1], [0], [0], [1], [0, 0, 1, 1], [], []>} : vector<16x8xf32>, vector<8x32xf32>, vector<16x32xf32> -> vector<16x32xf32>
    %23 = arith.addf %9, %22 : vector<16x32xf32>
    %24 = tpu.iota {dimensions = array<i32: 1>} : vector<16x8xi32>
    %25 = vector.broadcast %2 : vector<16x1xi32> to vector<16x8xi32>
    %26 = arith.cmpi eq, %24, %25 : vector<16x8xi32>
    %27 = arith.extui %26 : vector<16x8xi1> to vector<16x8xi32>
    %28 = arith.sitofp %27 : vector<16x8xi32> to vector<16x8xf32>
    %c120 = arith.constant 120 : index
    %c0_5 = arith.constant 0 : index
    %29 = vector.load %arg3[%c120, %c0_5] : memref<128x32xf32, #tpu.memory_space<vmem>>, vector<8x32xf32>
    %cst_6 = arith.constant dense<0.000000e+00> : vector<16x32xf32>
    %30 = tpu.matmul %28, %29, %cst_6 {dimension_numbers = #tpu.dot_dimension_numbers<[1], [0], [0], [1], [0, 0, 1, 1], [], []>} : vector<16x8xf32>, vector<8x32xf32>, vector<16x32xf32> -> vector<16x32xf32>
    %31 = arith.addf %23, %30 : vector<16x32xf32>
    %c0_7 = arith.constant 0 : index
    %c0_8 = arith.constant 0 : index
    %32 = vector.load %arg4[%c0_7, %c0_8] : memref<24x128xf32, #tpu.memory_space<vmem>>, vector<1x32xf32>
    %c1 = arith.constant 1 : index
    %c0_9 = arith.constant 0 : index
    %33 = vector.load %arg4[%c1, %c0_9] : memref<24x128xf32, #tpu.memory_space<vmem>>, vector<1x32xf32>
    %cst_10 = arith.constant dense<0.000000e+00> : vector<16xf32>
    %34 = vector.multi_reduction <add>, %31, %cst_10 [1] : vector<16x32xf32> to vector<16xf32>
    %35 = vector.shape_cast %34 : vector<16xf32> to vector<16x1xf32>
    %cst_11 = arith.constant 3.200000e+01 : f32
    %36 = vector.broadcast %cst_11 : f32 to vector<16x1xf32>
    %37 = arith.divf %35, %36 : vector<16x1xf32>
    %38 = vector.broadcast %37 : vector<16x1xf32> to vector<16x32xf32>
    %39 = arith.subf %31, %38 : vector<16x32xf32>
    %40 = arith.mulf %39, %39 : vector<16x32xf32>
    %cst_12 = arith.constant dense<0.000000e+00> : vector<16xf32>
    %41 = vector.multi_reduction <add>, %40, %cst_12 [1] : vector<16x32xf32> to vector<16xf32>
    %42 = vector.shape_cast %41 : vector<16xf32> to vector<16x1xf32>
    %cst_13 = arith.constant 3.200000e+01 : f32
    %43 = vector.broadcast %cst_13 : f32 to vector<16x1xf32>
    %44 = arith.divf %42, %43 : vector<16x1xf32>
    %45 = vector.broadcast %37 : vector<16x1xf32> to vector<16x32xf32>
    %46 = arith.subf %31, %45 : vector<16x32xf32>
    %cst_14 = arith.constant 9.99999996E-13 : f32
    %47 = vector.broadcast %cst_14 : f32 to vector<16x1xf32>
    %48 = arith.addf %44, %47 : vector<16x1xf32>
    %49 = math.rsqrt %48 : vector<16x1xf32>
    %50 = vector.broadcast %49 : vector<16x1xf32> to vector<16x32xf32>
    %51 = arith.mulf %46, %50 : vector<16x32xf32>
    %52 = vector.broadcast %32 : vector<1x32xf32> to vector<16x32xf32>
    %53 = arith.mulf %51, %52 : vector<16x32xf32>
    %54 = vector.broadcast %33 : vector<1x32xf32> to vector<16x32xf32>
    %55 = arith.addf %53, %54 : vector<16x32xf32>
    %c0_15 = arith.constant 0 : index
    %c0_16 = arith.constant 0 : index
    %56 = vector.load %arg2[%c0_15, %c0_16] : memref<1x16xi32, #tpu.memory_space<vmem>>, vector<1x16xi32>
    %c0_i32_17 = arith.constant 0 : i32
    %57 = vector.broadcast %c0_i32_17 : i32 to vector<1x16xi32>
    %58 = arith.cmpi ne, %56, %57 : vector<1x16xi32>
    %59 = tpu.iota {dimensions = array<i32: 0>} : vector<16x16xi32>
    %60 = tpu.iota {dimensions = array<i32: 1>} : vector<16x16xi32>
    %c0_i32_18 = arith.constant 0 : i32
    %61 = vector.broadcast %c0_i32_18 : i32 to vector<16x16xi32>
    %62 = arith.cmpi sge, %59, %61 : vector<16x16xi32>
    %c8_i32_19 = arith.constant 8 : i32
    %63 = vector.broadcast %c8_i32_19 : i32 to vector<16x16xi32>
    %64 = arith.cmpi slt, %59, %63 : vector<16x16xi32>
    %65 = arith.andi %62, %64 : vector<16x16xi1>
    %c0_i32_20 = arith.constant 0 : i32
    %66 = vector.broadcast %c0_i32_20 : i32 to vector<16x16xi32>
    %67 = arith.cmpi sge, %60, %66 : vector<16x16xi32>
    %68 = arith.andi %65, %67 : vector<16x16xi1>
    %c8_i32_21 = arith.constant 8 : i32
    %69 = vector.broadcast %c8_i32_21 : i32 to vector<16x16xi32>
    %70 = arith.cmpi slt, %60, %69 : vector<16x16xi32>
    %71 = arith.andi %68, %70 : vector<16x16xi1>
    %c8_i32_22 = arith.constant 8 : i32
    %72 = vector.broadcast %c8_i32_22 : i32 to vector<16x16xi32>
    %73 = arith.cmpi sge, %59, %72 : vector<16x16xi32>
    %c16_i32 = arith.constant 16 : i32
    %74 = vector.broadcast %c16_i32 : i32 to vector<16x16xi32>
    %75 = arith.cmpi slt, %59, %74 : vector<16x16xi32>
    %76 = arith.andi %73, %75 : vector<16x16xi1>
    %c8_i32_23 = arith.constant 8 : i32
    %77 = vector.broadcast %c8_i32_23 : i32 to vector<16x16xi32>
    %78 = arith.cmpi sge, %60, %77 : vector<16x16xi32>
    %79 = arith.andi %76, %78 : vector<16x16xi1>
    %c16_i32_24 = arith.constant 16 : i32
    %80 = vector.broadcast %c16_i32_24 : i32 to vector<16x16xi32>
    %81 = arith.cmpi slt, %60, %80 : vector<16x16xi32>
    %82 = arith.andi %79, %81 : vector<16x16xi1>
    %83 = arith.ori %71, %82 : vector<16x16xi1>
    %84 = vector.broadcast %58 : vector<1x16xi1> to vector<16x16xi1>
    %85 = arith.andi %83, %84 : vector<16x16xi1>
    %cst_25 = arith.constant 0.000000e+00 : f32
    %cst_26 = arith.constant -1.000000e+09 : f32
    %86 = vector.broadcast %cst_25 : f32 to vector<16x16xf32>
    %87 = vector.broadcast %cst_26 : f32 to vector<16x16xf32>
    %88 = arith.select %85, %86, %87 : vector<16x16xi1>, vector<16x16xf32>
    %c0_27 = arith.constant 0 : index
    %c0_28 = arith.constant 0 : index
    %c0_29 = arith.constant 0 : index
    %89 = vector.load %arg5[%c0_27, %c0_28, %c0_29] : memref<2x32x96xf32, #tpu.memory_space<vmem>>, vector<1x32x96xf32>
    %90 = vector.shape_cast %89 : vector<1x32x96xf32> to vector<32x96xf32>
    %cst_30 = arith.constant dense<0.000000e+00> : vector<16x96xf32>
    %91 = tpu.matmul %55, %90, %cst_30 {dimension_numbers = #tpu.dot_dimension_numbers<[1], [0], [0], [1], [0, 0, 1, 1], [], []>} : vector<16x32xf32>, vector<32x96xf32>, vector<16x96xf32> -> vector<16x96xf32>
    %c2 = arith.constant 2 : index
    %c0_31 = arith.constant 0 : index
    %92 = vector.load %arg4[%c2, %c0_31] : memref<24x128xf32, #tpu.memory_space<vmem>>, vector<1x96xf32>
    %93 = vector.broadcast %92 : vector<1x96xf32> to vector<16x96xf32>
    %94 = arith.addf %91, %93 : vector<16x96xf32>
    %95 = vector.extract_strided_slice %94 {offsets = [0, 0], sizes = [16, 32], strides = [1, 1]} : vector<16x96xf32> to vector<16x32xf32>
    %96 = vector.extract_strided_slice %94 {offsets = [0, 32], sizes = [16, 32], strides = [1, 1]} : vector<16x96xf32> to vector<16x32xf32>
    %97 = vector.extract_strided_slice %94 {offsets = [0, 64], sizes = [16, 32], strides = [1, 1]} : vector<16x96xf32> to vector<16x32xf32>
    %98 = vector.extract_strided_slice %95 {offsets = [0, 0], sizes = [16, 16], strides = [1, 1]} : vector<16x32xf32> to vector<16x16xf32>
    %99 = vector.extract_strided_slice %96 {offsets = [0, 0], sizes = [16, 16], strides = [1, 1]} : vector<16x32xf32> to vector<16x16xf32>
    %cst_32 = arith.constant dense<0.000000e+00> : vector<16x16xf32>
    %100 = tpu.matmul %98, %99, %cst_32 {dimension_numbers = #tpu.dot_dimension_numbers<[1], [1], [0], [0], [0, 0, 1, 0], [], []>} : vector<16x16xf32>, vector<16x16xf32>, vector<16x16xf32> -> vector<16x16xf32>
    %101 = arith.addf %100, %88 : vector<16x16xf32>
    %cst_33 = arith.constant dense<0xFF800000> : vector<16xf32>
    %102 = vector.multi_reduction <maximumf>, %101, %cst_33 [1] : vector<16x16xf32> to vector<16xf32>
    %103 = vector.shape_cast %102 : vector<16xf32> to vector<16x1xf32>
    %104 = vector.broadcast %103 : vector<16x1xf32> to vector<16x16xf32>
    %105 = arith.subf %101, %104 : vector<16x16xf32>
    %106 = math.exp %105 : vector<16x16xf32>
    %cst_34 = arith.constant dense<0.000000e+00> : vector<16xf32>
    %107 = vector.multi_reduction <add>, %106, %cst_34 [1] : vector<16x16xf32> to vector<16xf32>
    %108 = vector.shape_cast %107 : vector<16xf32> to vector<16x1xf32>
    %109 = tpu.reciprocal %108 {approx = true} : vector<16x1xf32> -> vector<16x1xf32>
    %110 = vector.broadcast %109 : vector<16x1xf32> to vector<16x16xf32>
    %111 = arith.mulf %106, %110 : vector<16x16xf32>
    %112 = vector.extract_strided_slice %97 {offsets = [0, 0], sizes = [16, 16], strides = [1, 1]} : vector<16x32xf32> to vector<16x16xf32>
    %cst_35 = arith.constant dense<0.000000e+00> : vector<16x16xf32>
    %113 = tpu.matmul %111, %112, %cst_35 {dimension_numbers = #tpu.dot_dimension_numbers<[1], [0], [0], [1], [0, 0, 1, 1], [], []>} : vector<16x16xf32>, vector<16x16xf32>, vector<16x16xf32> -> vector<16x16xf32>
    %114 = vector.extract_strided_slice %95 {offsets = [0, 16], sizes = [16, 16], strides = [1, 1]} : vector<16x32xf32> to vector<16x16xf32>
    %115 = vector.extract_strided_slice %96 {offsets = [0, 16], sizes = [16, 16], strides = [1, 1]} : vector<16x32xf32> to vector<16x16xf32>
    %cst_36 = arith.constant dense<0.000000e+00> : vector<16x16xf32>
    %116 = tpu.matmul %114, %115, %cst_36 {dimension_numbers = #tpu.dot_dimension_numbers<[1], [1], [0], [0], [0, 0, 1, 0], [], []>} : vector<16x16xf32>, vector<16x16xf32>, vector<16x16xf32> -> vector<16x16xf32>
    %117 = arith.addf %116, %88 : vector<16x16xf32>
    %cst_37 = arith.constant dense<0xFF800000> : vector<16xf32>
    %118 = vector.multi_reduction <maximumf>, %117, %cst_37 [1] : vector<16x16xf32> to vector<16xf32>
    %119 = vector.shape_cast %118 : vector<16xf32> to vector<16x1xf32>
    %120 = vector.broadcast %119 : vector<16x1xf32> to vector<16x16xf32>
    %121 = arith.subf %117, %120 : vector<16x16xf32>
    %122 = math.exp %121 : vector<16x16xf32>
    %cst_38 = arith.constant dense<0.000000e+00> : vector<16xf32>
    %123 = vector.multi_reduction <add>, %122, %cst_38 [1] : vector<16x16xf32> to vector<16xf32>
    %124 = vector.shape_cast %123 : vector<16xf32> to vector<16x1xf32>
    %125 = tpu.reciprocal %124 {approx = true} : vector<16x1xf32> -> vector<16x1xf32>
    %126 = vector.broadcast %125 : vector<16x1xf32> to vector<16x16xf32>
    %127 = arith.mulf %122, %126 : vector<16x16xf32>
    %128 = vector.extract_strided_slice %97 {offsets = [0, 16], sizes = [16, 16], strides = [1, 1]} : vector<16x32xf32> to vector<16x16xf32>
    %cst_39 = arith.constant dense<0.000000e+00> : vector<16x16xf32>
    %129 = tpu.matmul %127, %128, %cst_39 {dimension_numbers = #tpu.dot_dimension_numbers<[1], [0], [0], [1], [0, 0, 1, 1], [], []>} : vector<16x16xf32>, vector<16x16xf32>, vector<16x16xf32> -> vector<16x16xf32>
    %130 = tpu.concatenate %113, %129 in 1 : vector<16x16xf32>, vector<16x16xf32> -> vector<16x32xf32>
    %c0_40 = arith.constant 0 : index
    %c0_41 = arith.constant 0 : index
    %c0_42 = arith.constant 0 : index
    %131 = vector.load %arg6[%c0_40, %c0_41, %c0_42] : memref<2x32x32xf32, #tpu.memory_space<vmem>>, vector<1x32x32xf32>
    %132 = vector.shape_cast %131 : vector<1x32x32xf32> to vector<32x32xf32>
    %cst_43 = arith.constant dense<0.000000e+00> : vector<16x32xf32>
    %133 = tpu.matmul %130, %132, %cst_43 {dimension_numbers = #tpu.dot_dimension_numbers<[1], [0], [0], [1], [0, 0, 1, 1], [], []>} : vector<16x32xf32>, vector<32x32xf32>, vector<16x32xf32> -> vector<16x32xf32>
    %c3 = arith.constant 3 : index
    %c0_44 = arith.constant 0 : index
    %134 = vector.load %arg4[%c3, %c0_44] : memref<24x128xf32, #tpu.memory_space<vmem>>, vector<1x32xf32>
    %135 = vector.broadcast %134 : vector<1x32xf32> to vector<16x32xf32>
    %136 = arith.addf %133, %135 : vector<16x32xf32>
    %137 = arith.addf %55, %136 : vector<16x32xf32>
    %c4 = arith.constant 4 : index
    %c0_45 = arith.constant 0 : index
    %138 = vector.load %arg4[%c4, %c0_45] : memref<24x128xf32, #tpu.memory_space<vmem>>, vector<1x32xf32>
    %c5 = arith.constant 5 : index
    %c0_46 = arith.constant 0 : index
    %139 = vector.load %arg4[%c5, %c0_46] : memref<24x128xf32, #tpu.memory_space<vmem>>, vector<1x32xf32>
    %cst_47 = arith.constant dense<0.000000e+00> : vector<16xf32>
    %140 = vector.multi_reduction <add>, %137, %cst_47 [1] : vector<16x32xf32> to vector<16xf32>
    %141 = vector.shape_cast %140 : vector<16xf32> to vector<16x1xf32>
    %cst_48 = arith.constant 3.200000e+01 : f32
    %142 = vector.broadcast %cst_48 : f32 to vector<16x1xf32>
    %143 = arith.divf %141, %142 : vector<16x1xf32>
    %144 = vector.broadcast %143 : vector<16x1xf32> to vector<16x32xf32>
    %145 = arith.subf %137, %144 : vector<16x32xf32>
    %146 = arith.mulf %145, %145 : vector<16x32xf32>
    %cst_49 = arith.constant dense<0.000000e+00> : vector<16xf32>
    %147 = vector.multi_reduction <add>, %146, %cst_49 [1] : vector<16x32xf32> to vector<16xf32>
    %148 = vector.shape_cast %147 : vector<16xf32> to vector<16x1xf32>
    %cst_50 = arith.constant 3.200000e+01 : f32
    %149 = vector.broadcast %cst_50 : f32 to vector<16x1xf32>
    %150 = arith.divf %148, %149 : vector<16x1xf32>
    %151 = vector.broadcast %143 : vector<16x1xf32> to vector<16x32xf32>
    %152 = arith.subf %137, %151 : vector<16x32xf32>
    %cst_51 = arith.constant 9.99999996E-13 : f32
    %153 = vector.broadcast %cst_51 : f32 to vector<16x1xf32>
    %154 = arith.addf %150, %153 : vector<16x1xf32>
    %155 = math.rsqrt %154 : vector<16x1xf32>
    %156 = vector.broadcast %155 : vector<16x1xf32> to vector<16x32xf32>
    %157 = arith.mulf %152, %156 : vector<16x32xf32>
    %158 = vector.broadcast %138 : vector<1x32xf32> to vector<16x32xf32>
    %159 = arith.mulf %157, %158 : vector<16x32xf32>
    %160 = vector.broadcast %139 : vector<1x32xf32> to vector<16x32xf32>
    %161 = arith.addf %159, %160 : vector<16x32xf32>
    %c0_52 = arith.constant 0 : index
    %c0_53 = arith.constant 0 : index
    %c0_54 = arith.constant 0 : index
    %162 = vector.load %arg7[%c0_52, %c0_53, %c0_54] : memref<2x32x64xf32, #tpu.memory_space<vmem>>, vector<1x32x64xf32>
    %163 = vector.shape_cast %162 : vector<1x32x64xf32> to vector<32x64xf32>
    %cst_55 = arith.constant dense<0.000000e+00> : vector<16x64xf32>
    %164 = tpu.matmul %161, %163, %cst_55 {dimension_numbers = #tpu.dot_dimension_numbers<[1], [0], [0], [1], [0, 0, 1, 1], [], []>} : vector<16x32xf32>, vector<32x64xf32>, vector<16x64xf32> -> vector<16x64xf32>
    %c6 = arith.constant 6 : index
    %c0_56 = arith.constant 0 : index
    %165 = vector.load %arg4[%c6, %c0_56] : memref<24x128xf32, #tpu.memory_space<vmem>>, vector<1x64xf32>
    %166 = vector.broadcast %165 : vector<1x64xf32> to vector<16x64xf32>
    %167 = arith.addf %164, %166 : vector<16x64xf32>
    %168 = arith.mulf %167, %167 : vector<16x64xf32>
    %169 = arith.mulf %167, %168 : vector<16x64xf32>
    %cst_57 = arith.constant 4.471500e-02 : f32
    %170 = vector.broadcast %cst_57 : f32 to vector<16x64xf32>
    %171 = arith.mulf %170, %169 : vector<16x64xf32>
    %172 = arith.addf %167, %171 : vector<16x64xf32>
    %cst_58 = arith.constant 0.797884583 : f32
    %173 = vector.broadcast %cst_58 : f32 to vector<16x64xf32>
    %174 = arith.mulf %173, %172 : vector<16x64xf32>
    %175 = math.tanh %174 : vector<16x64xf32>
    %cst_59 = arith.constant 1.000000e+00 : f32
    %176 = vector.broadcast %cst_59 : f32 to vector<16x64xf32>
    %177 = arith.addf %176, %175 : vector<16x64xf32>
    %cst_60 = arith.constant 5.000000e-01 : f32
    %178 = vector.broadcast %cst_60 : f32 to vector<16x64xf32>
    %179 = arith.mulf %178, %177 : vector<16x64xf32>
    %180 = arith.mulf %167, %179 : vector<16x64xf32>
    %c0_61 = arith.constant 0 : index
    %c0_62 = arith.constant 0 : index
    %c0_63 = arith.constant 0 : index
    %181 = vector.load %arg8[%c0_61, %c0_62, %c0_63] : memref<2x64x32xf32, #tpu.memory_space<vmem>>, vector<1x64x32xf32>
    %182 = vector.shape_cast %181 : vector<1x64x32xf32> to vector<64x32xf32>
    %cst_64 = arith.constant dense<0.000000e+00> : vector<16x32xf32>
    %183 = tpu.matmul %180, %182, %cst_64 {dimension_numbers = #tpu.dot_dimension_numbers<[1], [0], [0], [1], [0, 0, 1, 1], [], []>} : vector<16x64xf32>, vector<64x32xf32>, vector<16x32xf32> -> vector<16x32xf32>
    %c7 = arith.constant 7 : index
    %c0_65 = arith.constant 0 : index
    %184 = vector.load %arg4[%c7, %c0_65] : memref<24x128xf32, #tpu.memory_space<vmem>>, vector<1x32xf32>
    %185 = vector.broadcast %184 : vector<1x32xf32> to vector<16x32xf32>
    %186 = arith.addf %183, %185 : vector<16x32xf32>
    %187 = arith.addf %161, %186 : vector<16x32xf32>
    %c8 = arith.constant 8 : index
    %c0_66 = arith.constant 0 : index
    %188 = vector.load %arg4[%c8, %c0_66] : memref<24x128xf32, #tpu.memory_space<vmem>>, vector<1x32xf32>
    %c9 = arith.constant 9 : index
    %c0_67 = arith.constant 0 : index
    %189 = vector.load %arg4[%c9, %c0_67] : memref<24x128xf32, #tpu.memory_space<vmem>>, vector<1x32xf32>
    %cst_68 = arith.constant dense<0.000000e+00> : vector<16xf32>
    %190 = vector.multi_reduction <add>, %187, %cst_68 [1] : vector<16x32xf32> to vector<16xf32>
    %191 = vector.shape_cast %190 : vector<16xf32> to vector<16x1xf32>
    %cst_69 = arith.constant 3.200000e+01 : f32
    %192 = vector.broadcast %cst_69 : f32 to vector<16x1xf32>
    %193 = arith.divf %191, %192 : vector<16x1xf32>
    %194 = vector.broadcast %193 : vector<16x1xf32> to vector<16x32xf32>
    %195 = arith.subf %187, %194 : vector<16x32xf32>
    %196 = arith.mulf %195, %195 : vector<16x32xf32>
    %cst_70 = arith.constant dense<0.000000e+00> : vector<16xf32>
    %197 = vector.multi_reduction <add>, %196, %cst_70 [1] : vector<16x32xf32> to vector<16xf32>
    %198 = vector.shape_cast %197 : vector<16xf32> to vector<16x1xf32>
    %cst_71 = arith.constant 3.200000e+01 : f32
    %199 = vector.broadcast %cst_71 : f32 to vector<16x1xf32>
    %200 = arith.divf %198, %199 : vector<16x1xf32>
    %201 = vector.broadcast %193 : vector<16x1xf32> to vector<16x32xf32>
    %202 = arith.subf %187, %201 : vector<16x32xf32>
    %cst_72 = arith.constant 9.99999996E-13 : f32
    %203 = vector.broadcast %cst_72 : f32 to vector<16x1xf32>
    %204 = arith.addf %200, %203 : vector<16x1xf32>
    %205 = math.rsqrt %204 : vector<16x1xf32>
    %206 = vector.broadcast %205 : vector<16x1xf32> to vector<16x32xf32>
    %207 = arith.mulf %202, %206 : vector<16x32xf32>
    %208 = vector.broadcast %188 : vector<1x32xf32> to vector<16x32xf32>
    %209 = arith.mulf %207, %208 : vector<16x32xf32>
    %210 = vector.broadcast %189 : vector<1x32xf32> to vector<16x32xf32>
    %211 = arith.addf %209, %210 : vector<16x32xf32>
    %c1_73 = arith.constant 1 : index
    %c0_74 = arith.constant 0 : index
    %c0_75 = arith.constant 0 : index
    %212 = vector.load %arg5[%c1_73, %c0_74, %c0_75] : memref<2x32x96xf32, #tpu.memory_space<vmem>>, vector<1x32x96xf32>
    %213 = vector.shape_cast %212 : vector<1x32x96xf32> to vector<32x96xf32>
    %cst_76 = arith.constant dense<0.000000e+00> : vector<16x96xf32>
    %214 = tpu.matmul %211, %213, %cst_76 {dimension_numbers = #tpu.dot_dimension_numbers<[1], [0], [0], [1], [0, 0, 1, 1], [], []>} : vector<16x32xf32>, vector<32x96xf32>, vector<16x96xf32> -> vector<16x96xf32>
    %c10 = arith.constant 10 : index
    %c0_77 = arith.constant 0 : index
    %215 = vector.load %arg4[%c10, %c0_77] : memref<24x128xf32, #tpu.memory_space<vmem>>, vector<1x96xf32>
    %216 = vector.broadcast %215 : vector<1x96xf32> to vector<16x96xf32>
    %217 = arith.addf %214, %216 : vector<16x96xf32>
    %218 = vector.extract_strided_slice %217 {offsets = [0, 0], sizes = [16, 32], strides = [1, 1]} : vector<16x96xf32> to vector<16x32xf32>
    %219 = vector.extract_strided_slice %217 {offsets = [0, 32], sizes = [16, 32], strides = [1, 1]} : vector<16x96xf32> to vector<16x32xf32>
    %220 = vector.extract_strided_slice %217 {offsets = [0, 64], sizes = [16, 32], strides = [1, 1]} : vector<16x96xf32> to vector<16x32xf32>
    %221 = vector.extract_strided_slice %218 {offsets = [0, 0], sizes = [16, 16], strides = [1, 1]} : vector<16x32xf32> to vector<16x16xf32>
    %222 = vector.extract_strided_slice %219 {offsets = [0, 0], sizes = [16, 16], strides = [1, 1]} : vector<16x32xf32> to vector<16x16xf32>
    %cst_78 = arith.constant dense<0.000000e+00> : vector<16x16xf32>
    %223 = tpu.matmul %221, %222, %cst_78 {dimension_numbers = #tpu.dot_dimension_numbers<[1], [1], [0], [0], [0, 0, 1, 0], [], []>} : vector<16x16xf32>, vector<16x16xf32>, vector<16x16xf32> -> vector<16x16xf32>
    %224 = arith.addf %223, %88 : vector<16x16xf32>
    %cst_79 = arith.constant dense<0xFF800000> : vector<16xf32>
    %225 = vector.multi_reduction <maximumf>, %224, %cst_79 [1] : vector<16x16xf32> to vector<16xf32>
    %226 = vector.shape_cast %225 : vector<16xf32> to vector<16x1xf32>
    %227 = vector.broadcast %226 : vector<16x1xf32> to vector<16x16xf32>
    %228 = arith.subf %224, %227 : vector<16x16xf32>
    %229 = math.exp %228 : vector<16x16xf32>
    %cst_80 = arith.constant dense<0.000000e+00> : vector<16xf32>
    %230 = vector.multi_reduction <add>, %229, %cst_80 [1] : vector<16x16xf32> to vector<16xf32>
    %231 = vector.shape_cast %230 : vector<16xf32> to vector<16x1xf32>
    %232 = tpu.reciprocal %231 {approx = true} : vector<16x1xf32> -> vector<16x1xf32>
    %233 = vector.broadcast %232 : vector<16x1xf32> to vector<16x16xf32>
    %234 = arith.mulf %229, %233 : vector<16x16xf32>
    %235 = vector.extract_strided_slice %220 {offsets = [0, 0], sizes = [16, 16], strides = [1, 1]} : vector<16x32xf32> to vector<16x16xf32>
    %cst_81 = arith.constant dense<0.000000e+00> : vector<16x16xf32>
    %236 = tpu.matmul %234, %235, %cst_81 {dimension_numbers = #tpu.dot_dimension_numbers<[1], [0], [0], [1], [0, 0, 1, 1], [], []>} : vector<16x16xf32>, vector<16x16xf32>, vector<16x16xf32> -> vector<16x16xf32>
    %237 = vector.extract_strided_slice %218 {offsets = [0, 16], sizes = [16, 16], strides = [1, 1]} : vector<16x32xf32> to vector<16x16xf32>
    %238 = vector.extract_strided_slice %219 {offsets = [0, 16], sizes = [16, 16], strides = [1, 1]} : vector<16x32xf32> to vector<16x16xf32>
    %cst_82 = arith.constant dense<0.000000e+00> : vector<16x16xf32>
    %239 = tpu.matmul %237, %238, %cst_82 {dimension_numbers = #tpu.dot_dimension_numbers<[1], [1], [0], [0], [0, 0, 1, 0], [], []>} : vector<16x16xf32>, vector<16x16xf32>, vector<16x16xf32> -> vector<16x16xf32>
    %240 = arith.addf %239, %88 : vector<16x16xf32>
    %cst_83 = arith.constant dense<0xFF800000> : vector<16xf32>
    %241 = vector.multi_reduction <maximumf>, %240, %cst_83 [1] : vector<16x16xf32> to vector<16xf32>
    %242 = vector.shape_cast %241 : vector<16xf32> to vector<16x1xf32>
    %243 = vector.broadcast %242 : vector<16x1xf32> to vector<16x16xf32>
    %244 = arith.subf %240, %243 : vector<16x16xf32>
    %245 = math.exp %244 : vector<16x16xf32>
    %cst_84 = arith.constant dense<0.000000e+00> : vector<16xf32>
    %246 = vector.multi_reduction <add>, %245, %cst_84 [1] : vector<16x16xf32> to vector<16xf32>
    %247 = vector.shape_cast %246 : vector<16xf32> to vector<16x1xf32>
    %248 = tpu.reciprocal %247 {approx = true} : vector<16x1xf32> -> vector<16x1xf32>
    %249 = vector.broadcast %248 : vector<16x1xf32> to vector<16x16xf32>
    %250 = arith.mulf %245, %249 : vector<16x16xf32>
    %251 = vector.extract_strided_slice %220 {offsets = [0, 16], sizes = [16, 16], strides = [1, 1]} : vector<16x32xf32> to vector<16x16xf32>
    %cst_85 = arith.constant dense<0.000000e+00> : vector<16x16xf32>
    %252 = tpu.matmul %250, %251, %cst_85 {dimension_numbers = #tpu.dot_dimension_numbers<[1], [0], [0], [1], [0, 0, 1, 1], [], []>} : vector<16x16xf32>, vector<16x16xf32>, vector<16x16xf32> -> vector<16x16xf32>
    %253 = tpu.concatenate %236, %252 in 1 : vector<16x16xf32>, vector<16x16xf32> -> vector<16x32xf32>
    %c1_86 = arith.constant 1 : index
    %c0_87 = arith.constant 0 : index
    %c0_88 = arith.constant 0 : index
    %254 = vector.load %arg6[%c1_86, %c0_87, %c0_88] : memref<2x32x32xf32, #tpu.memory_space<vmem>>, vector<1x32x32xf32>
    %255 = vector.shape_cast %254 : vector<1x32x32xf32> to vector<32x32xf32>
    %cst_89 = arith.constant dense<0.000000e+00> : vector<16x32xf32>
    %256 = tpu.matmul %253, %255, %cst_89 {dimension_numbers = #tpu.dot_dimension_numbers<[1], [0], [0], [1], [0, 0, 1, 1], [], []>} : vector<16x32xf32>, vector<32x32xf32>, vector<16x32xf32> -> vector<16x32xf32>
    %c11 = arith.constant 11 : index
    %c0_90 = arith.constant 0 : index
    %257 = vector.load %arg4[%c11, %c0_90] : memref<24x128xf32, #tpu.memory_space<vmem>>, vector<1x32xf32>
    %258 = vector.broadcast %257 : vector<1x32xf32> to vector<16x32xf32>
    %259 = arith.addf %256, %258 : vector<16x32xf32>
    %260 = arith.addf %211, %259 : vector<16x32xf32>
    %c12 = arith.constant 12 : index
    %c0_91 = arith.constant 0 : index
    %261 = vector.load %arg4[%c12, %c0_91] : memref<24x128xf32, #tpu.memory_space<vmem>>, vector<1x32xf32>
    %c13 = arith.constant 13 : index
    %c0_92 = arith.constant 0 : index
    %262 = vector.load %arg4[%c13, %c0_92] : memref<24x128xf32, #tpu.memory_space<vmem>>, vector<1x32xf32>
    %cst_93 = arith.constant dense<0.000000e+00> : vector<16xf32>
    %263 = vector.multi_reduction <add>, %260, %cst_93 [1] : vector<16x32xf32> to vector<16xf32>
    %264 = vector.shape_cast %263 : vector<16xf32> to vector<16x1xf32>
    %cst_94 = arith.constant 3.200000e+01 : f32
    %265 = vector.broadcast %cst_94 : f32 to vector<16x1xf32>
    %266 = arith.divf %264, %265 : vector<16x1xf32>
    %267 = vector.broadcast %266 : vector<16x1xf32> to vector<16x32xf32>
    %268 = arith.subf %260, %267 : vector<16x32xf32>
    %269 = arith.mulf %268, %268 : vector<16x32xf32>
    %cst_95 = arith.constant dense<0.000000e+00> : vector<16xf32>
    %270 = vector.multi_reduction <add>, %269, %cst_95 [1] : vector<16x32xf32> to vector<16xf32>
    %271 = vector.shape_cast %270 : vector<16xf32> to vector<16x1xf32>
    %cst_96 = arith.constant 3.200000e+01 : f32
    %272 = vector.broadcast %cst_96 : f32 to vector<16x1xf32>
    %273 = arith.divf %271, %272 : vector<16x1xf32>
    %274 = vector.broadcast %266 : vector<16x1xf32> to vector<16x32xf32>
    %275 = arith.subf %260, %274 : vector<16x32xf32>
    %cst_97 = arith.constant 9.99999996E-13 : f32
    %276 = vector.broadcast %cst_97 : f32 to vector<16x1xf32>
    %277 = arith.addf %273, %276 : vector<16x1xf32>
    %278 = math.rsqrt %277 : vector<16x1xf32>
    %279 = vector.broadcast %278 : vector<16x1xf32> to vector<16x32xf32>
    %280 = arith.mulf %275, %279 : vector<16x32xf32>
    %281 = vector.broadcast %261 : vector<1x32xf32> to vector<16x32xf32>
    %282 = arith.mulf %280, %281 : vector<16x32xf32>
    %283 = vector.broadcast %262 : vector<1x32xf32> to vector<16x32xf32>
    %284 = arith.addf %282, %283 : vector<16x32xf32>
    %c1_98 = arith.constant 1 : index
    %c0_99 = arith.constant 0 : index
    %c0_100 = arith.constant 0 : index
    %285 = vector.load %arg7[%c1_98, %c0_99, %c0_100] : memref<2x32x64xf32, #tpu.memory_space<vmem>>, vector<1x32x64xf32>
    %286 = vector.shape_cast %285 : vector<1x32x64xf32> to vector<32x64xf32>
    %cst_101 = arith.constant dense<0.000000e+00> : vector<16x64xf32>
    %287 = tpu.matmul %284, %286, %cst_101 {dimension_numbers = #tpu.dot_dimension_numbers<[1], [0], [0], [1], [0, 0, 1, 1], [], []>} : vector<16x32xf32>, vector<32x64xf32>, vector<16x64xf32> -> vector<16x64xf32>
    %c14 = arith.constant 14 : index
    %c0_102 = arith.constant 0 : index
    %288 = vector.load %arg4[%c14, %c0_102] : memref<24x128xf32, #tpu.memory_space<vmem>>, vector<1x64xf32>
    %289 = vector.broadcast %288 : vector<1x64xf32> to vector<16x64xf32>
    %290 = arith.addf %287, %289 : vector<16x64xf32>
    %291 = arith.mulf %290, %290 : vector<16x64xf32>
    %292 = arith.mulf %290, %291 : vector<16x64xf32>
    %cst_103 = arith.constant 4.471500e-02 : f32
    %293 = vector.broadcast %cst_103 : f32 to vector<16x64xf32>
    %294 = arith.mulf %293, %292 : vector<16x64xf32>
    %295 = arith.addf %290, %294 : vector<16x64xf32>
    %cst_104 = arith.constant 0.797884583 : f32
    %296 = vector.broadcast %cst_104 : f32 to vector<16x64xf32>
    %297 = arith.mulf %296, %295 : vector<16x64xf32>
    %298 = math.tanh %297 : vector<16x64xf32>
    %cst_105 = arith.constant 1.000000e+00 : f32
    %299 = vector.broadcast %cst_105 : f32 to vector<16x64xf32>
    %300 = arith.addf %299, %298 : vector<16x64xf32>
    %cst_106 = arith.constant 5.000000e-01 : f32
    %301 = vector.broadcast %cst_106 : f32 to vector<16x64xf32>
    %302 = arith.mulf %301, %300 : vector<16x64xf32>
    %303 = arith.mulf %290, %302 : vector<16x64xf32>
    %c1_107 = arith.constant 1 : index
    %c0_108 = arith.constant 0 : index
    %c0_109 = arith.constant 0 : index
    %304 = vector.load %arg8[%c1_107, %c0_108, %c0_109] : memref<2x64x32xf32, #tpu.memory_space<vmem>>, vector<1x64x32xf32>
    %305 = vector.shape_cast %304 : vector<1x64x32xf32> to vector<64x32xf32>
    %cst_110 = arith.constant dense<0.000000e+00> : vector<16x32xf32>
    %306 = tpu.matmul %303, %305, %cst_110 {dimension_numbers = #tpu.dot_dimension_numbers<[1], [0], [0], [1], [0, 0, 1, 1], [], []>} : vector<16x64xf32>, vector<64x32xf32>, vector<16x32xf32> -> vector<16x32xf32>
    %c15 = arith.constant 15 : index
    %c0_111 = arith.constant 0 : index
    %307 = vector.load %arg4[%c15, %c0_111] : memref<24x128xf32, #tpu.memory_space<vmem>>, vector<1x32xf32>
    %308 = vector.broadcast %307 : vector<1x32xf32> to vector<16x32xf32>
    %309 = arith.addf %306, %308 : vector<16x32xf32>
    %310 = arith.addf %284, %309 : vector<16x32xf32>
    %c16 = arith.constant 16 : index
    %c0_112 = arith.constant 0 : index
    %311 = vector.load %arg4[%c16, %c0_112] : memref<24x128xf32, #tpu.memory_space<vmem>>, vector<1x32xf32>
    %c17 = arith.constant 17 : index
    %c0_113 = arith.constant 0 : index
    %312 = vector.load %arg4[%c17, %c0_113] : memref<24x128xf32, #tpu.memory_space<vmem>>, vector<1x32xf32>
    %cst_114 = arith.constant dense<0.000000e+00> : vector<16xf32>
    %313 = vector.multi_reduction <add>, %310, %cst_114 [1] : vector<16x32xf32> to vector<16xf32>
    %314 = vector.shape_cast %313 : vector<16xf32> to vector<16x1xf32>
    %cst_115 = arith.constant 3.200000e+01 : f32
    %315 = vector.broadcast %cst_115 : f32 to vector<16x1xf32>
    %316 = arith.divf %314, %315 : vector<16x1xf32>
    %317 = vector.broadcast %316 : vector<16x1xf32> to vector<16x32xf32>
    %318 = arith.subf %310, %317 : vector<16x32xf32>
    %319 = arith.mulf %318, %318 : vector<16x32xf32>
    %cst_116 = arith.constant dense<0.000000e+00> : vector<16xf32>
    %320 = vector.multi_reduction <add>, %319, %cst_116 [1] : vector<16x32xf32> to vector<16xf32>
    %321 = vector.shape_cast %320 : vector<16xf32> to vector<16x1xf32>
    %cst_117 = arith.constant 3.200000e+01 : f32
    %322 = vector.broadcast %cst_117 : f32 to vector<16x1xf32>
    %323 = arith.divf %321, %322 : vector<16x1xf32>
    %324 = vector.broadcast %316 : vector<16x1xf32> to vector<16x32xf32>
    %325 = arith.subf %310, %324 : vector<16x32xf32>
    %cst_118 = arith.constant 9.99999996E-13 : f32
    %326 = vector.broadcast %cst_118 : f32 to vector<16x1xf32>
    %327 = arith.addf %323, %326 : vector<16x1xf32>
    %328 = math.rsqrt %327 : vector<16x1xf32>
    %329 = vector.broadcast %328 : vector<16x1xf32> to vector<16x32xf32>
    %330 = arith.mulf %325, %329 : vector<16x32xf32>
    %331 = vector.broadcast %311 : vector<1x32xf32> to vector<16x32xf32>
    %332 = arith.mulf %330, %331 : vector<16x32xf32>
    %333 = vector.broadcast %312 : vector<1x32xf32> to vector<16x32xf32>
    %334 = arith.addf %332, %333 : vector<16x32xf32>
    %c64 = arith.constant 64 : index
    %c0_119 = arith.constant 0 : index
    %335 = vector.load %arg9[%c64, %c0_119] : memref<96x128xf32, #tpu.memory_space<vmem>>, vector<32x128xf32>
    %cst_120 = arith.constant dense<0.000000e+00> : vector<16x128xf32>
    %336 = tpu.matmul %334, %335, %cst_120 {dimension_numbers = #tpu.dot_dimension_numbers<[1], [0], [0], [1], [0, 0, 1, 1], [], []>} : vector<16x32xf32>, vector<32x128xf32>, vector<16x128xf32> -> vector<16x128xf32>
    %c20 = arith.constant 20 : index
    %c0_121 = arith.constant 0 : index
    %337 = vector.load %arg4[%c20, %c0_121] : memref<24x128xf32, #tpu.memory_space<vmem>>, vector<1x128xf32>
    %338 = vector.broadcast %337 : vector<1x128xf32> to vector<16x128xf32>
    %339 = arith.addf %336, %338 : vector<16x128xf32>
    %c0_122 = arith.constant 0 : index
    %c0_123 = arith.constant 0 : index
    %340 = vector.load %arg11[%c0_122, %c0_123] : memref<16x128xf32, #tpu.memory_space<vmem>>, vector<16x128xf32>
    tpu.vector_store %arg11[%c0_122, %c0_123], %339 {strides = array<i32>} : memref<16x128xf32, #tpu.memory_space<vmem>>, vector<16x128xf32>,
    %341 = tpu.iota {dimensions = array<i32: 0>} : vector<2x16xi32>
    %342 = tpu.iota {dimensions = array<i32: 1>} : vector<2x16xi32>
    %c8_i32_124 = arith.constant 8 : i32
    %343 = vector.broadcast %c8_i32_124 : i32 to vector<2x16xi32>
    %344 = arith.muli %341, %343 : vector<2x16xi32>
    %345 = arith.cmpi eq, %342, %344 : vector<2x16xi32>
    %346 = arith.extui %345 : vector<2x16xi1> to vector<2x16xi32>
    %347 = arith.sitofp %346 : vector<2x16xi32> to vector<2x16xf32>
    %cst_125 = arith.constant dense<0.000000e+00> : vector<2x32xf32>
    %348 = tpu.matmul %347, %334, %cst_125 {dimension_numbers = #tpu.dot_dimension_numbers<[1], [0], [0], [1], [0, 0, 1, 1], [], []>} : vector<2x16xf32>, vector<16x32xf32>, vector<2x32xf32> -> vector<2x32xf32>
    %c0_126 = arith.constant 0 : index
    %c0_127 = arith.constant 0 : index
    %349 = vector.load %arg9[%c0_126, %c0_127] : memref<96x128xf32, #tpu.memory_space<vmem>>, vector<32x32xf32>
    %cst_128 = arith.constant dense<0.000000e+00> : vector<2x32xf32>
    %350 = tpu.matmul %348, %349, %cst_128 {dimension_numbers = #tpu.dot_dimension_numbers<[1], [0], [0], [1], [0, 0, 1, 1], [], []>} : vector<2x32xf32>, vector<32x32xf32>, vector<2x32xf32> -> vector<2x32xf32>
    %c18 = arith.constant 18 : index
    %c0_129 = arith.constant 0 : index
    %351 = vector.load %arg4[%c18, %c0_129] : memref<24x128xf32, #tpu.memory_space<vmem>>, vector<1x32xf32>
    %352 = vector.broadcast %351 : vector<1x32xf32> to vector<2x32xf32>
    %353 = arith.addf %350, %352 : vector<2x32xf32>
    %354 = math.tanh %353 : vector<2x32xf32>
    %c32 = arith.constant 32 : index
    %c0_130 = arith.constant 0 : index
    %355 = vector.load %arg9[%c32, %c0_130] : memref<96x128xf32, #tpu.memory_space<vmem>>, vector<32x128xf32>
    %cst_131 = arith.constant dense<0.000000e+00> : vector<2x128xf32>
    %356 = tpu.matmul %354, %355, %cst_131 {dimension_numbers = #tpu.dot_dimension_numbers<[1], [0], [0], [1], [0, 0, 1, 1], [], []>} : vector<2x32xf32>, vector<32x128xf32>, vector<2x128xf32> -> vector<2x128xf32>
    %c19 = arith.constant 19 : index
    %c0_132 = arith.constant 0 : index
    %357 = vector.load %arg4[%c19, %c0_132] : memref<24x128xf32, #tpu.memory_space<vmem>>, vector<1x128xf32>
    %358 = vector.broadcast %357 : vector<1x128xf32> to vector<2x128xf32>
    %359 = arith.addf %356, %358 : vector<2x128xf32>
    %c0_133 = arith.constant 0 : index
    %c0_134 = arith.constant 0 : index
    %360 = vector.load %arg10[%c0_133, %c0_134] : memref<2x128xf32, #tpu.memory_space<vmem>>, vector<2x128xf32>
    tpu.vector_store %arg10[%c0_133, %c0_134], %359 {strides = array<i32>} : memref<2x128xf32, #tpu.memory_space<vmem>>, vector<2x128xf32>,
    return
  }
  func.func @transform_0(%arg0: i32) -> (i32, i32) {
    %c0_i32 = arith.constant 0 : i32
    %c0_i32_0 = arith.constant 0 : i32
    %c0_i32_1 = arith.constant 0 : i32
    return %c0_i32, %c0_i32_0 : i32, i32
  }
  func.func @transform_1(%arg0: i32) -> (i32, i32) {
    %c0_i32 = arith.constant 0 : i32
    %c0_i32_0 = arith.constant 0 : i32
    %c0_i32_1 = arith.constant 0 : i32
    return %c0_i32, %c0_i32_0 : i32, i32
  }
  func.func @transform_2(%arg0: i32) -> (i32, i32) {
    %c0_i32 = arith.constant 0 : i32
    %c0_i32_0 = arith.constant 0 : i32
    %c0_i32_1 = arith.constant 0 : i32
    return %c0_i32, %c0_i32_0 : i32, i32
  }
  func.func @transform_3(%arg0: i32) -> (i32, i32) {
    %c0_i32 = arith.constant 0 : i32
    %c0_i32_0 = arith.constant 0 : i32
    %c0_i32_1 = arith.constant 0 : i32
    return %c0_i32, %c0_i32_0 : i32, i32
  }
  func.func @transform_4(%arg0: i32) -> (i32, i32, i32) {
    %c0_i32 = arith.constant 0 : i32
    %c0_i32_0 = arith.constant 0 : i32
    %c0_i32_1 = arith.constant 0 : i32
    %c0_i32_2 = arith.constant 0 : i32
    return %c0_i32, %c0_i32_0, %c0_i32_1 : i32, i32, i32
  }
  func.func @transform_5(%arg0: i32) -> (i32, i32, i32) {
    %c0_i32 = arith.constant 0 : i32
    %c0_i32_0 = arith.constant 0 : i32
    %c0_i32_1 = arith.constant 0 : i32
    %c0_i32_2 = arith.constant 0 : i32
    return %c0_i32, %c0_i32_0, %c0_i32_1 : i32, i32, i32
  }
  func.func @transform_6(%arg0: i32) -> (i32, i32, i32) {
    %c0_i32 = arith.constant 0 : i32
    %c0_i32_0 = arith.constant 0 : i32
    %c0_i32_1 = arith.constant 0 : i32
    %c0_i32_2 = arith.constant 0 : i32
    return %c0_i32, %c0_i32_0, %c0_i32_1 : i32, i32, i32
  }
  func.func @transform_7(%arg0: i32) -> (i32, i32, i32) {
    %c0_i32 = arith.constant 0 : i32
    %c0_i32_0 = arith.constant 0 : i32
    %c0_i32_1 = arith.constant 0 : i32
    %c0_i32_2 = arith.constant 0 : i32
    return %c0_i32, %c0_i32_0, %c0_i32_1 : i32, i32, i32
  }
  func.func @transform_8(%arg0: i32) -> (i32, i32) {
    %c0_i32 = arith.constant 0 : i32
    %c0_i32_0 = arith.constant 0 : i32
    %c0_i32_1 = arith.constant 0 : i32
    return %c0_i32, %c0_i32_0 : i32, i32
  }
  func.func @transform_9(%arg0: i32) -> (i32, i32) {
    %c0_i32 = arith.constant 0 : i32
    %c0_i32_0 = arith.constant 0 : i32
    %c0_i32_1 = arith.constant 0 : i32
    return %c0_i32, %c0_i32_0 : i32, i32
  }
  func.func @transform_10(%arg0: i32) -> (i32, i32) {
    %c0_i32 = arith.constant 0 : i32
    %c0_i32_0 = arith.constant 0 : i32
    %c0_i32_1 = arith.constant 0 : i32
    return %c0_i32, %c0_i32_0 : i32, i32
  }
}

</mosaic_0001>

<bundles_post_ra>
// kernel: tpu_custom_call.1
= control target key start
LH: loop header
LB: loop body
LE: loop exit
PB: predicated region body
PF: predicated region fallthrough
CT: control target
= control target key end

     0   :  { %16 = vsyncpa [#allocation3], 0  ;;  %s3699_s0 = inlined_call_operand.vmem [shape: s32[16,2], index: 0, kind: input, shape index: {}]   ;;  %s3700_s1 = inlined_call_operand.vmem [shape: s32[1,16], index: 1, kind: input, shape index: {}]   ;;  %s3701_s2 = inlined_call_operand.vmem [shape: f32[128,32], index: 2, kind: input, shape index: {}]   ;;  %s3702_s3 = inlined_call_operand.hbm [shape: f32[24,128], index: 3, kind: input, shape index: {}]   ;;  %s3703_s4 = inlined_call_operand.vmem [shape: f32[2,32,96], index: 4, kind: input, shape index: {}]   ;;  %s3704_s5 = inlined_call_operand.vmem [shape: f32[2,32,32], index: 5, kind: input, shape index: {}]   ;;  %s3705_s6 = inlined_call_operand.vmem [shape: f32[2,32,64], index: 6, kind: input, shape index: {}]   ;;  %s3706_s7 = inlined_call_operand.vmem [shape: f32[2,64,32], index: 7, kind: input, shape index: {}]   ;;  %s3707_s8 = inlined_call_operand.vmem [shape: f32[96,128], index: 8, kind: input, shape index: {}]   ;;  %s3708_s9 = inlined_call_operand.hbm [shape: f32[2,128], index: 9, kind: output, shape index: {0}]   ;;  %s3709_s10 = inlined_call_operand.hbm [shape: f32[16,128], index: 10, kind: output, shape index: {1}]  }
   0x1   :  { %17 = vsyncpa [#allocation4], 0 }
   0x2   :  { %18 = vsyncpa [#allocation7], 0  ;;  %s3167_s13 = smov [#allocation2]  }
   0x3   :  { %s30_s14 = sshll.u32 %s3167_s13, 4  ;;  %s31_s14 = int_to_ptr.vmem [resolvable:$true] %s30_s14 }
   0x4   :  { %s3109_s15 = scalar_lea.vmem %s31_s14, 384  ;;  %p3114_p1 = scmp.lt.s32.totalorder %s31_s14, %s31_s14 }
   0x5   :  { %p3110_p0 = scmp.ne.s32.totalorder %s31_s14, %s3109_s15  ;;  %p3115_p2 = scmp.lt.s32.totalorder %s3109_s15, %s3109_s15 }
   0x7   :  { %p3116_p3 = por %p3115_p2, %p3114_p1 }
   0x9   :  { %p3117_p4 = pnand %p3116_p3, %p3110_p0 }
   0xb   :  { %3120 = shalt.err (!%p3117_p4)
}
   0xc   :  { %s3168_s16 = smov 128   ;;  %s3169_s17 = smov 8  }
   0xd   :  { %36 = dma.hbm_to_vmem [thread:$0]  %s3702_s3, 384, %s31_s14, [#allocation3], %s3168_s16, %s3168_s16, %s3169_s17  }
   0xe   :  { %3161 = dma.done.wait [#allocation3], 384  }
   0xf   :  { %3162 = vsyncadd [#allocation3], 4294966912  ;;  %v52_v0 = vlaneseq  ;;  %v3170_v1 = vmov 1   ;;  %v3171_v2 = vmov 0   ;;  %vm94_vm1 = vcmask 64512   ;;  %v50_v9 = vld [vmem:[%s3699_s0] sm:$0xff] }
  0x10   :  { %3037 = vset.pattern.permute.xlu1 %v3170_v1  ;;  %3036 = vset.pattern.permute.xlu0 %v3171_v2  ;;  %v3172_v7 = vmov 0.0   ;;  %v78_v10 = vld [vmem:[%s3701_s2 + $0x60] sm:$0xff]  ;;  %v77_v11 = vld [vmem:[%s3701_s2 + $0x58] sm:$0xff]  ;;  %v51_v12 = vld [vmem:[%s3699_s0 + $0x8] sm:$0xff]  ;;  %vm176_vm5 = vcmask 850944   ;;  %vm356_vm10 = vcmask 261120  }
  0x11   :  { %v3245_v3 = vand.u32 127, %v52_v0  ;;  %v3247_v4 = vshrl.u32 %v52_v0, 7  ;;  %259 = vperm.xlu1 %3037, %v50_v9   ;;  %55 = vperm.xlu0 %3036, %v50_v9   ;;  %v76_v13 = vld [vmem:[%s3701_s2 + $0x50] sm:$0xff]  ;;  %v93_v14 = vld [vmem:[%s3701_s2 + $0x68] sm:$0xff]  ;;  %v270_v17 = vld [vmem:[%s3701_s2 + $0x78] sm:$0xff]  ;;  %vm530_vm11 = vcmask 130048  }
  0x12   :  { %2786 = vmatprep.subr.mxu1 %v78_v10  ;;  %v75_v15 = vld [vmem:[%s3701_s2 + $0x48] sm:$0xff]  ;;  %2781 = vmatprep.subr.mxu0 %v93_v14  ;;  %v74_v18 = vld [vmem:[%s3701_s2 + $0x40] sm:$0xff]  ;;  %v73_v19 = vld [vmem:[%s3701_s2 + $0x38] sm:$0xff]  ;;  %s3173_s20 = smov 96   ;;  %s3176_s23 = smov 80  }
  0x13   :  { %vm82_vm0 = vcmp.eq.s32.totalorder %v3247_v4, %v3245_v3  ;;  %v81_v5 = vadd.s32 8, %v3247_v4  ;;  %v84_v6 = vadd.s32 8, %v3245_v3  ;;  %2787 = vmatpush3.msra.mxu1 %v78_v10  ;;  %2782 = vmatpush3.msra.mxu0 %v93_v14  ;;  %v72_v20 = vld [vmem:[%s3701_s2 + $0x30] sm:$0xff]  ;;  %v71_v21 = vld [vmem:[%s3701_s2 + $0x28] sm:$0xff]  ;;  %v70_v22 = vld [vmem:[%s3701_s2 + $0x20] sm:$0xff]  ;;  %vm416_vm13 = vcmp.ge.s32.totalorder %v3245_v3, 8 }
  0x14   :  { %v2556_v8 = vsel %vm82_vm0, 1.0, %v3172_v7  ;;  %2788 = vmatprep.subr.mxu1 %v77_v11  ;;  %2815 = vmatprep.subr.mxu0 %v270_v17  ;;  %v69_v23 = vld [vmem:[%s3701_s2 + $0x18] sm:$0xff]  ;;  %v68_v24 = vld [vmem:[%s3701_s2 + $0x10] sm:$0xff]  ;;  %v67_v25 = vld [vmem:[%s3701_s2 + $0x8] sm:$0xff]  ;;  %vm419_vm14 = vcmp.lt.s32.totalorder %v3245_v3, 16  ;;  %s3177_s24 = smov 112  }
  0x15   :  { %2783 = vmatprep.mubr.msk.f32.mxu0 %vm94_vm1, %v2556_v8  ;;  %vm83_vm2 = vcmp.eq.s32.totalorder %v81_v5, %v3245_v3  ;;  %vm86_vm3 = vcmp.eq.s32.totalorder %v81_v5, %v84_v6  ;;  %262 = vperm.xlu1 %3037, %v51_v12   ;;  %v66_v26 = vld [vmem:[%s3701_s2] sm:$0xff]  ;;  %v437_v57 = vld [vmem:[%s3703_s4 + $0x18] sm:$0xff]  ;;  %v436_v58 = vld [vmem:[%s3703_s4 + $0x10] sm:$0xff]  ;;  %s3178_s25 = smov 48   ;;  %s3179_s12 = smov 16  }
  0x16   :  { %58 = vperm.xlu0 %3036, %v51_v12   ;;  %vm88_vm4 = vmor %vm83_vm2, %vm86_vm3  ;;  %2789 = vmatpush3.msra.mxu1 %v77_v11  ;;  %v435_v59 = vld [vmem:[%s3703_s4 + $0x8] sm:$0xff]  ;;  %v434_v60 = vld [vmem:[%s3703_s4] sm:$0xff] }
  0x17   :  { %v2557_v16 = vsel %vm88_vm4, 1.0, %v3172_v7  ;;  %2790 = vmatprep.subr.mxu1 %v76_v13  ;;  %v2566_v8 = vld [vmem:[#allocation2] ss:$0 sm:$0xff]  ;;  %v2567_v10 = vld [vmem:[#allocation2 + $0x1] ss:$0 sm:$0xff]  ;;  %vm421_vm15 = vmand %vm416_vm13, %vm419_vm14  ;;  %vm1186_vm4 = vcmask 523264  }
  0x18   :  { %2791 = vmatpush3.msra.mxu1 %v76_v13  ;;  %2784 = vmatmul.mubr.msk.f32.vlgmr.msra.gmra.mxu0 %vm94_vm1, %v2557_v16 }
  0x19   :  { %2792 = vmatprep.subr.mxu1 %v75_v15  ;;  %2816 = vmatpush3.msra.mxu0 %v270_v17  ;;  %v2568_v17 = vld [vmem:[#allocation2 + $0x2] ss:$0 sm:$0xff] }
  0x1a   :  { %2793 = vmatpush3.msra.mxu1 %v75_v15  ;;  %3038 = vset.pattern.permute.xlu0 %v3170_v1 }
  0x1b   :  { %2794 = vmatprep.subr.mxu1 %v74_v18  ;;  %2820 = vmatprep.subr.mxu0 %v437_v57 }
  0x1c   :  { %2795 = vmatpush3.msra.mxu1 %v74_v18 }
  0x1d   :  { %2796 = vmatprep.subr.mxu1 %v73_v19 }
  0x1e   :  { %2797 = vmatpush3.msra.mxu1 %v73_v19 }
  0x1f   :  { %2798 = vmatprep.subr.mxu1 %v72_v20 }
  0x20   :  { %2799 = vmatpush3.msra.mxu1 %v72_v20 }
  0x21   :  { %2800 = vmatprep.subr.mxu1 %v71_v21 }
  0x22   :  { %2801 = vmatpush3.msra.mxu1 %v71_v21 }
  0x23   :  { %2802 = vmatprep.subr.mxu1 %v70_v22 }
  0x24   :  { %2803 = vmatpush3.msra.mxu1 %v70_v22 }
  0x25   :  { %2804 = vmatprep.subr.mxu1 %v69_v23 }
  0x26   :  { %2805 = vmatpush3.msra.mxu1 %v69_v23 }
  0x27   :  { %2806 = vmatprep.subr.mxu1 %v68_v24 }
  0x28   :  { %2807 = vmatpush3.msra.mxu1 %v68_v24  ;;  %v396_v24 = vld [vmem:[%s3700_s1] sm:$0x1]  ;;  %s3175_s1 = smov 64  }
  0x29   :  { %2808 = vmatprep.subr.mxu1 %v67_v25  ;;  %vm397_vm12 = vcmp.ne.s32.totalorder %v396_v24, 0 }
  0x2a   :  { %2809 = vmatpush3.msra.mxu1 %v67_v25  ;;  %v427_v25 = vsub.s32 0, %v3247_v4 }
  0x2b   :  { %2810 = vmatprep.subr.mxu1 %v66_v26 }
  0x2c   :  { %2811 = vmatpush3.msra.mxu1 %v66_v26  ;;  %v424_v26 = vsel %vm397_vm12, 1, %v3171_v2 }
  0x8c   :  { %v260_v27 = vpop.permute.xlu1 %259  ;;  %v56_v28 = vpop.permute.xlu0 %55 }
  0x8d   :  { %vm264_vm6 = vcmp.eq.s32.totalorder %v3245_v3, %v260_v27  ;;  %vm60_vm7 = vcmp.eq.s32.totalorder %v3245_v3, %v56_v28  ;;  %v428_v27 = vrot.slane %v424_v26, %v427_v25  ;;  %v3174_v28 = vmov -1e+09  }
  0x8e   :  { %v2562_v29 = vsel %vm264_vm6, 1.0, %v3172_v7  ;;  %v2554_v30 = vsel %vm60_vm7, 1.0, %v3172_v7 }
  0x8f   :  { %2812 = vmatprep.mubr.msk.f32.mxu1 %vm176_vm5, %v2554_v30  ;;  %2817 = vmatprep.mubr.msk.f32.mxu0 %vm94_vm1, %v2562_v29  ;;  %vm429_vm0 = vcmp.eq.s32.totalorder %v428_v27, 1  ;;  %v936_v27 = vld [vmem:[%s3704_s5 + $0x18] sm:$0xff] }
  0x90   :  { %v263_v31 = vpop.permute.xlu1 %262  ;;  %vm431_vm2 = vmand %vm421_vm15, %vm429_vm0 }
  0x91   :  { %v59_v32 = vpop.permute.xlu0 %58  ;;  %vm265_vm8 = vcmp.eq.s32.totalorder %v3245_v3, %v263_v31  ;;  %v3367_v29 = vsel %vm431_vm2, 0.0, %v3174_v28 }
  0x92   :  { %vm61_vm9 = vcmp.eq.s32.totalorder %v3245_v3, %v59_v32  ;;  %v2563_v33 = vsel %vm265_vm8, 1.0, %v3172_v7 }
  0x93   :  { %v2555_v34 = vsel %vm61_vm9, 1.0, %v3172_v7  ;;  %2818 = vmatmul.mubr.msk.f32.vlgmr.msra.gmra.mxu0 %vm94_vm1, %v2563_v33  ;;  %vm407_vm1 = vcmp.lt.s32.totalorder %v3245_v3, 8 }
  0x94   :  { %2813 = vmatmul.mubr.msk.f32.vlgmr.msra.gmra.mxu1 %vm176_vm5, %v2555_v34  ;;  %2821 = vmatpush3.msra.mxu0 %v437_v57  ;;  %vm430_vm3 = vmand %vm407_vm1, %vm429_vm0  ;;  %vm3180_vm5 = vmmov 0  }
  0x95   :  { %2822 = vmatprep.subr.mxu0 %v436_v58  ;;  %v3369_v31 = vsel %vm430_vm3, 0.0, %v3174_v28  ;;  %v934_v28 = vld [vmem:[%s3704_s5 + $0x8] sm:$0xff] }
  0x96   :  { %2823 = vmatpush3.msra.mxu0 %v436_v58 }
  0x97   :  { %2824 = vmatprep.subr.mxu0 %v435_v59 }
  0x98   :  { %2825 = vmatpush3.msra.mxu0 %v435_v59 }
  0x99   :  { %2826 = vmatprep.subr.mxu0 %v434_v60 }
  0x9a   :  { %2827 = vmatpush3.msra.mxu0 %v434_v60 }
  0xd8   :  { %v2785_v35 = vpop.f32.mrf.mxu0 }
  0xda   :  { %v167_v36 = vpop.f32.mrf.mxu0 }
 0x153   :  { %v2819_v38 = vpop.f32.mrf.mxu0 }
 0x154   :  { %v2814_v37 = vpop.f32.mrf.mxu1 }
 0x155   :  { %v255_v39 = vadd.f32 %v2814_v37, %v2785_v35  ;;  %v343_v43 = vpop.f32.mrf.mxu0 }
 0x156   :  { %v249_v40 = vpop.f32.mrf.mxu1 }
 0x157   :  { %v353_v41 = vadd.f32 %v2819_v38, %v255_v39  ;;  %v250_v42 = vadd.f32 %v249_v40, %v167_v36 }
 0x159   :  { %v352_v44 = vadd.f32 %v343_v43, %v250_v42  ;;  %v360_v45 = vsel %vm356_vm10, %v353_v41, 0.0 }
 0x15a   :  { %361 = vadd.xlane.f32.xlu1 %v360_v45 }
 0x15b   :  { %v357_v46 = vsel %vm356_vm10, %v352_v44, 0.0 }
 0x15c   :  { %358 = vadd.xlane.f32.xlu0 %v357_v46 }
 0x1e3   :  { %v362_v47 = vpop.xlane.xlu1 %361 }
 0x1e4   :  { %v365_v48 = vmul.f32 0.03125, %v362_v47 }
 0x1e5   :  { %v359_v49 = vpop.xlane.xlu0 %358 }
 0x1e6   :  { %v364_v50 = vmul.f32 0.03125, %v359_v49  ;;  %v367_v51 = vsub.f32 %v353_v41, %v365_v48 }
 0x1e8   :  { %v366_v52 = vsub.f32 %v352_v44, %v364_v50  ;;  %v369_v55 = vmul.f32 %v367_v51, %v367_v51 }
 0x1ea   :  { %v368_v53 = vmul.f32 %v366_v52, %v366_v52  ;;  %v373_v56 = vsel %vm356_vm10, %v369_v55, 0.0 }
 0x1ec   :  { %v370_v54 = vsel %vm356_vm10, %v368_v53, 0.0 }
 0x1ed   :  { %371 = vadd.xlane.f32.xlu0 %v370_v54 }
 0x1f1   :  { %374 = vadd.xlane.f32.xlu0 %v373_v56 }
 0x276   :  { %v372_v61 = vpop.xlane.xlu0 %371 }
 0x277   :  { %v376_v62 = vmul.f32 0.03125, %v372_v61 }
 0x279   :  { %v378_v63 = vadd.f32 1e-12, %v376_v62 }
 0x27a   :  { %v375_v0 = vpop.xlane.xlu0 %374 }
 0x27b   :  { %3039 = vrsqrt.f32 %v378_v63  ;;  %v377_v1 = vmul.f32 0.03125, %v375_v0 }
 0x27d   :  { %v379_v5 = vadd.f32 1e-12, %v377_v1 }
 0x27f   :  { %3041 = vrsqrt.f32 %v379_v5 }
 0x288   :  { %v3040_v6 = vpop.eup %3039 }
 0x289   :  { %v382_v9 = vmul.f32 %v3040_v6, %v366_v52 }
 0x28b   :  { %v388_v11 = vmul.f32 %v2566_v8, %v382_v9 }
 0x28c   :  { %v3042_v12 = vpop.eup %3041 }
 0x28d   :  { %v383_v13 = vmul.f32 %v3042_v12, %v367_v51  ;;  %v3335_v14 = vadd.f32 %v2567_v10, %v388_v11 }
 0x28f   :  { %v389_v15 = vmul.f32 %v2566_v8, %v383_v13  ;;  %2828 = vmatprep.mubr.msk.f32.mxu0 %vm356_vm10, %v3335_v14 }
 0x291   :  { %v3339_v16 = vadd.f32 %v2567_v10, %v389_v15 }
 0x293   :  { %2829 = vmatmul.mubr.msk.f32.vlgmr.msra.gmra.mxu0 %vm356_vm10, %v3339_v16 }
 0x353   :  { %v2830_v18 = vpop.f32.mrf.mxu0 }
 0x354   :  { %v3343_v19 = vadd.f32 %v2830_v18, %v2568_v17 }
 0x355   :  { %v515_v20 = vpop.f32.mrf.mxu0 }
 0x356   :  { %v3345_v21 = vadd.f32 %v2568_v17, %v515_v20  ;;  %528 = vrot.lane.b32.xlu1 %v3343_v19, %s3173_s20 }
 0x358   :  { %526 = vrot.lane.b32.xlu0 %v3345_v21, %s3173_s20  ;;  %2835 = vmatprep.mubr.msk.f32.mxu0 %vm530_vm11, %v3345_v21 }
 0x3c8   :  { %v529_v22 = vpop.permute.xlu1 %528 }
 0x3c9   :  { %2831 = vmatprep.subr.msk.mxu0 %vm530_vm11, %v529_v22 }
 0x3ca   :  { %2832 = vmatpush3.xpose.msk.msra.mxu0 %vm530_vm11, %v529_v22  ;;  %v527_v23 = vpop.permute.xlu0 %526 }
 0x3cb   :  { %2833 = vmatprep.subr.msk.mxu0 %vm530_vm11, %v527_v23 }
 0x3ce   :  { %2834 = vmatpush3.xpose.msk.msra.mxu0 %vm530_vm11, %v527_v23 }
 0x3d1   :  { %2836 = vmatmul.mubr.msk.f32.vlgmr.msra.gmra.mxu0 %vm530_vm11, %v3343_v19 }
 0x491   :  { %v2837_v30 = vpop.f32.mrf.mxu0 }
 0x492   :  { %v611_v32 = vadd.f32 %v2837_v30, %v3367_v29  ;;  %v933_v30 = vld [vmem:[%s3704_s5] sm:$0xff] }
 0x493   :  { %v605_v2 = vpop.f32.mrf.mxu0 }
 0x494   :  { %v606_v33 = vadd.f32 %v605_v2, %v3369_v31  ;;  %v617_v34 = vsel %vm530_vm11, %v611_v32, -inf }
 0x495   :  { %618 = vmax.xlane.f32.xlu0 %v617_v34 }
 0x496   :  { %v614_v35 = vsel %vm530_vm11, %v606_v33, -inf }
 0x497   :  { %615 = vmax.xlane.f32.xlu1 %v614_v35 }
 0x4a8   :  { %638 = vrot.lane.b32.xlu1 %v3343_v19, %s3175_s1 }
 0x4ac   :  { %729 = vrot.lane.b32.xlu1 %v3343_v19, %s3176_s23 }
 0x4b0   :  { %727 = vrot.lane.b32.xlu1 %v3345_v21, %s3176_s23 }
 0x51e   :  { %v619_v36 = vpop.xlane.xlu0 %618 }
 0x51f   :  { %v621_v37 = vsub.f32 %v611_v32, %v619_v36 }
 0x520   :  { %v616_v38 = vpop.xlane.xlu1 %615 }
 0x521   :  { %v624_v39 = vmul.f32 1.442695, %v621_v37  ;;  %v620_v40 = vsub.f32 %v606_v33, %v616_v38  ;;  %v2583_v37 = vld [vmem:[#allocation2 + $0x3] ss:$0 sm:$0xff] }
 0x523   :  { %3043 = vpow2.f32 %v624_v39  ;;  %v622_v41 = vmul.f32 1.442695, %v620_v40 }
 0x524   :  { %v639_v42 = vpop.permute.xlu1 %638 }
 0x525   :  { %3045 = vpow2.f32 %v622_v41  ;;  %2838 = vmatprep.subr.mxu0 %v639_v42 }
 0x526   :  { %2839 = vmatpush3.msra.mxu0 %v639_v42 }
 0x528   :  { %v730_v47 = vpop.permute.xlu1 %729 }
 0x52c   :  { %v728_v48 = vpop.permute.xlu1 %727 }
 0x530   :  { %v3044_v43 = vpop.eup %3043 }
 0x531   :  { %v629_v44 = vsel %vm530_vm11, %v3044_v43, 0.0 }
 0x532   :  { %v3046_v45 = vpop.eup %3045  ;;  %630 = vadd.xlane.f32.xlu0 %v629_v44 }
 0x533   :  { %v626_v46 = vsel %vm530_vm11, %v3046_v45, 0.0 }
 0x534   :  { %627 = vadd.xlane.f32.xlu1 %v626_v46 }
 0x545   :  { %725 = vrot.lane.b32.xlu1 %v3343_v19, %s3177_s24 }
 0x548   :  { %636 = vrot.lane.b32.xlu0 %v3345_v21, %s3175_s1 }
 0x54c   :  { %723 = vrot.lane.b32.xlu0 %v3345_v21, %s3177_s24 }
 0x5bb   :  { %v631_v49 = vpop.xlane.xlu0 %630 }
 0x5bc   :  { %3047 = vrcp.f32 %v631_v49 }
 0x5bd   :  { %v628_v50 = vpop.xlane.xlu1 %627 }
 0x5be   :  { %3049 = vrcp.f32 %v628_v50 }
 0x5bf   :  { %v637_v51 = vpop.permute.xlu0 %636 }
 0x5c0   :  { %2840 = vmatprep.subr.mxu0 %v637_v51 }
 0x5c1   :  { %2841 = vmatpush3.msra.mxu0 %v637_v51  ;;  %v726_v57 = vpop.permute.xlu1 %725 }
 0x5c2   :  { %2845 = vmatprep.subr.msk.mxu0 %vm530_vm11, %v730_v47 }
 0x5c3   :  { %v724_v56 = vpop.permute.xlu0 %723 }
 0x5c9   :  { %v3048_v52 = vpop.eup %3047 }
 0x5ca   :  { %v635_v55 = vmul.f32 %v3048_v52, %v3044_v43 }
 0x5cb   :  { %v3050_v53 = vpop.eup %3049 }
 0x5cc   :  { %v634_v54 = vmul.f32 %v3050_v53, %v3046_v45 }
 0x5ce   :  { %2842 = vmatprep.mubr.msk.f32.mxu0 %vm530_vm11, %v634_v54 }
 0x5cf   :  { %2843 = vmatmul.mubr.msk.f32.vlgmr.msra.gmra.mxu0 %vm530_vm11, %v635_v55  ;;  %v1067_v55 = vld [vmem:[%s3705_s6 + $0x10] sm:$0xff] }
 0x5d0   :  { %2846 = vmatpush3.xpose.msk.msra.mxu0 %vm530_vm11, %v730_v47  ;;  %2849 = vmatprep.mubr.msk.f32.mxu0 %vm530_vm11, %v724_v56  ;;  %v1066_v56 = vld [vmem:[%s3705_s6 + $0x8] sm:$0xff] }
 0x5d1   :  { %2847 = vmatprep.subr.msk.mxu0 %vm530_vm11, %v728_v48 }
 0x5d4   :  { %2848 = vmatpush3.xpose.msk.msra.mxu0 %vm530_vm11, %v728_v48 }
 0x5d7   :  { %2850 = vmatmul.mubr.msk.f32.vlgmr.msra.gmra.mxu0 %vm530_vm11, %v726_v57  ;;  %v1065_v57 = vld [vmem:[%s3705_s6] sm:$0xff] }
 0x68f   :  { %v3397_v58 = vpop.f32.mrf.mxu0 }
 0x691   :  { %v714_v59 = vpop.f32.mrf.mxu0 }
 0x697   :  { %v2851_v60 = vpop.f32.mrf.mxu0 }
 0x698   :  { %v811_v61 = vadd.f32 %v2851_v60, %v3367_v29 }
 0x699   :  { %v805_v62 = vpop.f32.mrf.mxu0 }
 0x69a   :  { %v806_v63 = vadd.f32 %v805_v62, %v3369_v31  ;;  %v817_v0 = vsel %vm530_vm11, %v811_v61, -inf }
 0x69b   :  { %818 = vmax.xlane.f32.xlu1 %v817_v0 }
 0x69c   :  { %v814_v1 = vsel %vm530_vm11, %v806_v63, -inf }
 0x69d   :  { %815 = vmax.xlane.f32.xlu0 %v814_v1  ;;  %v2586_v1 = vld [vmem:[#allocation2 + $0x4] ss:$0 sm:$0xff] }
 0x6ac   :  { %838 = vrot.lane.b32.xlu1 %v3343_v19, %s3178_s25 }
 0x724   :  { %v819_v5 = vpop.xlane.xlu1 %818 }
 0x725   :  { %v821_v6 = vsub.f32 %v811_v61, %v819_v5 }
 0x726   :  { %v816_v8 = vpop.xlane.xlu0 %815 }
 0x727   :  { %v824_v9 = vmul.f32 1.442695, %v821_v6  ;;  %v820_v10 = vsub.f32 %v806_v63, %v816_v8  ;;  %v2587_v6 = vld [vmem:[#allocation2 + $0x5] ss:$0 sm:$0xff] }
 0x728   :  { %v839_v11 = vpop.permute.xlu1 %838 }
 0x729   :  { %3051 = vpow2.f32 %v824_v9  ;;  %v822_v12 = vmul.f32 1.442695, %v820_v10  ;;  %2852 = vmatprep.subr.mxu1 %v839_v11 }
 0x72a   :  { %2853 = vmatpush3.msra.mxu1 %v839_v11 }
 0x72b   :  { %3053 = vpow2.f32 %v822_v12 }
 0x736   :  { %v3052_v13 = vpop.eup %3051 }
 0x737   :  { %v829_v15 = vsel %vm530_vm11, %v3052_v13, 0.0 }
 0x738   :  { %v3054_v17 = vpop.eup %3053  ;;  %830 = vadd.xlane.f32.xlu0 %v829_v15  ;;  %v1180_v15 = vld [vmem:[%s3706_s7 + $0x38] sm:$0xff] }
 0x739   :  { %v826_v18 = vsel %vm530_vm11, %v3054_v17, 0.0 }
 0x73c   :  { %827 = vadd.xlane.f32.xlu0 %v826_v18  ;;  %v1178_v18 = vld [vmem:[%s3706_s7 + $0x28] sm:$0xff] }
 0x752   :  { %836 = vrot.lane.b32.xlu0 %v3345_v21, %s3178_s25  ;;  %v935_v21 = vld [vmem:[%s3704_s5 + $0x10] sm:$0xff] }
 0x7c1   :  { %v831_v19 = vpop.xlane.xlu0 %830 }
 0x7c2   :  { %3055 = vrcp.f32 %v831_v19  ;;  %v1177_v19 = vld [vmem:[%s3706_s7 + $0x20] sm:$0xff] }
 0x7c5   :  { %v828_v20 = vpop.xlane.xlu0 %827 }
 0x7c6   :  { %3057 = vrcp.f32 %v828_v20  ;;  %v1176_v20 = vld [vmem:[%s3706_s7 + $0x18] sm:$0xff] }
 0x7c9   :  { %v837_v22 = vpop.permute.xlu0 %836 }
 0x7ca   :  { %2854 = vmatprep.subr.mxu1 %v837_v22 }
 0x7cb   :  { %2855 = vmatpush3.msra.mxu1 %v837_v22  ;;  %v1175_v22 = vld [vmem:[%s3706_s7 + $0x10] sm:$0xff] }
 0x7cc   :  { %2859 = vmatprep.subr.mxu1 %v936_v27 }
 0x7cf   :  { %v3056_v23 = vpop.eup %3055 }
 0x7d0   :  { %v835_v26 = vmul.f32 %v3056_v23, %v3052_v13  ;;  %v1174_v23 = vld [vmem:[%s3706_s7 + $0x8] sm:$0xff] }
 0x7d3   :  { %v3058_v24 = vpop.eup %3057 }
 0x7d4   :  { %v834_v25 = vmul.f32 %v3058_v24, %v3054_v17  ;;  %v1179_v17 = vld [vmem:[%s3706_s7 + $0x30] sm:$0xff]  ;;  %v1173_v24 = vld [vmem:[%s3706_s7] sm:$0xff] }
 0x7d6   :  { %2856 = vmatprep.mubr.msk.f32.mxu1 %vm530_vm11, %v834_v25  ;;  %v2588_v25 = vld [vmem:[#allocation2 + $0x6] ss:$0 sm:$0xff] }
 0x7d7   :  { %2857 = vmatmul.mubr.msk.f32.vlgmr.msra.gmra.mxu1 %vm530_vm11, %v835_v26 }
 0x7d8   :  { %2860 = vmatpush3.msra.mxu1 %v936_v27 }
 0x7d9   :  { %2861 = vmatprep.subr.mxu1 %v935_v21 }
 0x7da   :  { %2862 = vmatpush3.msra.mxu1 %v935_v21 }
 0x7db   :  { %2863 = vmatprep.subr.mxu1 %v934_v28 }
 0x7dc   :  { %2864 = vmatpush3.msra.mxu1 %v934_v28 }
 0x7dd   :  { %2865 = vmatprep.subr.mxu1 %v933_v30 }
 0x7de   :  { %2866 = vmatpush3.msra.mxu1 %v933_v30 }
 0x7df   :  { %2881 = vmatprep.subr.mxu1 %v1180_v15 }
 0x897   :  { %v2858_v32 = vpop.f32.mrf.mxu1 }
 0x899   :  { %v914_v2 = vpop.f32.mrf.mxu1 }
 0x89a   :  { %925 = vrot.lane.b32.xlu1 %v914_v2, %s3179_s12 }
 0x89e   :  { %927 = vrot.lane.b32.xlu1 %v2858_v32, %s3179_s12 }
 0x90c   :  { %v926_v33 = vpop.permute.xlu1 %925 }
 0x90d   :  { %v931_v34 = vsel %vm530_vm11, %v714_v59, %v926_v33 }
 0x90e   :  { %2867 = vmatprep.mubr.msk.f32.mxu1 %vm356_vm10, %v931_v34 }
 0x910   :  { %v928_v35 = vpop.permute.xlu1 %927 }
 0x911   :  { %v932_v36 = vsel %vm530_vm11, %v3397_v58, %v928_v35 }
 0x912   :  { %2868 = vmatmul.mubr.msk.f32.vlgmr.msra.gmra.mxu1 %vm356_vm10, %v932_v36 }
 0x913   :  { %2882 = vmatpush3.msra.mxu1 %v1180_v15 }
 0x914   :  { %2883 = vmatprep.subr.mxu1 %v1179_v17 }
 0x915   :  { %2884 = vmatpush3.msra.mxu1 %v1179_v17 }
 0x916   :  { %2885 = vmatprep.subr.mxu1 %v1178_v18 }
 0x917   :  { %2886 = vmatpush3.msra.mxu1 %v1178_v18  ;;  %v2594_v18 = vld [vmem:[#allocation2 + $0x8] ss:$0 sm:$0xff] }
 0x918   :  { %2887 = vmatprep.subr.mxu1 %v1177_v19 }
 0x919   :  { %2888 = vmatpush3.msra.mxu1 %v1177_v19 }
 0x91a   :  { %2889 = vmatprep.subr.mxu1 %v1176_v20 }
 0x91b   :  { %2890 = vmatpush3.msra.mxu1 %v1176_v20 }
 0x91c   :  { %2891 = vmatprep.subr.mxu1 %v1175_v22 }
 0x91d   :  { %2892 = vmatpush3.msra.mxu1 %v1175_v22 }
 0x91e   :  { %2893 = vmatprep.subr.mxu1 %v1174_v23 }
 0x91f   :  { %2894 = vmatpush3.msra.mxu1 %v1174_v23 }
 0x920   :  { %2895 = vmatprep.subr.mxu1 %v1173_v24 }
 0x921   :  { %2896 = vmatpush3.msra.mxu1 %v1173_v24  ;;  %v2595_v24 = vld [vmem:[#allocation2 + $0x9] ss:$0 sm:$0xff] }
 0x9d2   :  { %v2869_v38 = vpop.f32.mrf.mxu1 }
 0x9d3   :  { %v1020_v39 = vadd.f32 %v2869_v38, %v2583_v37 }
 0x9d4   :  { %v1014_v40 = vpop.f32.mrf.mxu1 }
 0x9d5   :  { %v1015_v41 = vadd.f32 %v2583_v37, %v1014_v40  ;;  %v1024_v42 = vadd.f32 %v1020_v39, %v3339_v16 }
 0x9d7   :  { %v1030_v43 = vsel %vm356_vm10, %v1024_v42, 0.0  ;;  %v1023_v44 = vadd.f32 %v1015_v41, %v3335_v14  ;;  %v1068_v14 = vld [vmem:[%s3705_s6 + $0x18] sm:$0xff] }
 0x9d8   :  { %1031 = vadd.xlane.f32.xlu1 %v1030_v43  ;;  %2870 = vmatprep.subr.mxu0 %v1068_v14 }
 0x9d9   :  { %v1027_v45 = vsel %vm356_vm10, %v1023_v44, 0.0  ;;  %2871 = vmatpush3.msra.mxu0 %v1068_v14 }
 0x9da   :  { %1028 = vadd.xlane.f32.xlu0 %v1027_v45  ;;  %2872 = vmatprep.subr.mxu0 %v1067_v55 }
 0x9db   :  { %2873 = vmatpush3.msra.mxu0 %v1067_v55 }
 0x9dc   :  { %2874 = vmatprep.subr.mxu0 %v1066_v56 }
 0x9dd   :  { %2875 = vmatpush3.msra.mxu0 %v1066_v56 }
 0x9de   :  { %2876 = vmatprep.subr.mxu0 %v1065_v57 }
 0x9df   :  { %2877 = vmatpush3.msra.mxu0 %v1065_v57 }
 0xa61   :  { %v1032_v46 = vpop.xlane.xlu1 %1031 }
 0xa62   :  { %v1034_v47 = vmul.f32 0.03125, %v1032_v46 }
 0xa63   :  { %v1029_v48 = vpop.xlane.xlu0 %1028 }
 0xa64   :  { %v1033_v49 = vmul.f32 0.03125, %v1029_v48  ;;  %v1036_v50 = vsub.f32 %v1024_v42, %v1034_v47  ;;  %v2591_v48 = vld [vmem:[#allocation2 + $0x7] ss:$0 sm:$0xff] }
 0xa66   :  { %v1035_v51 = vsub.f32 %v1023_v44, %v1033_v49  ;;  %v1038_v54 = vmul.f32 %v1036_v50, %v1036_v50 }
 0xa68   :  { %v1037_v52 = vmul.f32 %v1035_v51, %v1035_v51  ;;  %v1042_v16 = vsel %vm356_vm10, %v1038_v54, 0.0 }
 0xa6a   :  { %v1039_v53 = vsel %vm356_vm10, %v1037_v52, 0.0 }
 0xa6b   :  { %1040 = vadd.xlane.f32.xlu0 %v1039_v53 }
 0xa6f   :  { %1043 = vadd.xlane.f32.xlu0 %v1042_v16 }
 0xaf4   :  { %v1041_v58 = vpop.xlane.xlu0 %1040 }
 0xaf5   :  { %v1045_v59 = vmul.f32 0.03125, %v1041_v58 }
 0xaf7   :  { %v1047_v60 = vadd.f32 1e-12, %v1045_v59 }
 0xaf8   :  { %v1044_v61 = vpop.xlane.xlu0 %1043 }
 0xaf9   :  { %3059 = vrsqrt.f32 %v1047_v60  ;;  %v1046_v62 = vmul.f32 0.03125, %v1044_v61 }
 0xafb   :  { %v1048_v63 = vadd.f32 1e-12, %v1046_v62 }
 0xafd   :  { %3061 = vrsqrt.f32 %v1048_v63 }
 0xb06   :  { %v3060_v0 = vpop.eup %3059 }
 0xb07   :  { %v1051_v5 = vmul.f32 %v3060_v0, %v1035_v51 }
 0xb09   :  { %v1057_v8 = vmul.f32 %v2586_v1, %v1051_v5  ;;  %v2598_v5 = vld [vmem:[%s3703_s4 + $0x30] sm:$0xff] }
 0xb0a   :  { %v3062_v9 = vpop.eup %3061 }
 0xb0b   :  { %v1052_v10 = vmul.f32 %v3062_v9, %v1036_v50  ;;  %v3448_v11 = vadd.f32 %v2587_v6, %v1057_v8  ;;  %v2596_v8 = vld [vmem:[%s3703_s4 + $0x20] sm:$0xff] }
 0xb0d   :  { %v1058_v12 = vmul.f32 %v2586_v1, %v1052_v10  ;;  %2878 = vmatprep.mubr.msk.f32.mxu0 %vm356_vm10, %v3448_v11  ;;  %v2599_v1 = vld [vmem:[%s3703_s4 + $0x38] sm:$0xff] }
 0xb0e   :  { %2900 = vmatprep.subr.mxu0 %v2599_v1 }
 0xb0f   :  { %v1064_v13 = vadd.f32 %v2587_v6, %v1058_v12  ;;  %v2597_v6 = vld [vmem:[%s3703_s4 + $0x28] sm:$0xff] }
 0xb11   :  { %2879 = vmatmul.mubr.msk.f32.vlgmr.msra.gmra.mxu0 %vm356_vm10, %v1064_v13 }
 0xb12   :  { %2901 = vmatpush3.msra.mxu0 %v2599_v1 }
 0xb13   :  { %2902 = vmatprep.subr.mxu0 %v2598_v5 }
 0xb14   :  { %2903 = vmatpush3.msra.mxu0 %v2598_v5 }
 0xb15   :  { %2904 = vmatprep.subr.mxu0 %v2597_v6 }
 0xb16   :  { %2905 = vmatpush3.msra.mxu0 %v2597_v6 }
 0xb17   :  { %2906 = vmatprep.subr.mxu0 %v2596_v8 }
 0xb18   :  { %2907 = vmatpush3.msra.mxu0 %v2596_v8 }
 0xbd1   :  { %v2880_v26 = vpop.f32.mrf.mxu0 }
 0xbd2   :  { %v1152_v27 = vadd.f32 %v2880_v26, %v2588_v25 }
 0xbd3   :  { %v1146_v21 = vpop.f32.mrf.mxu0 }
 0xbd4   :  { %v1156_v28 = vmul.f32 %v1152_v27, %v1152_v27  ;;  %v1147_v30 = vadd.f32 %v2588_v25, %v1146_v21  ;;  %v2600_v21 = vld [vmem:[#allocation2 + $0xa] ss:$0 sm:$0xff] }
 0xbd6   :  { %v1158_v32 = vmul.f32 %v1156_v28, %v1152_v27  ;;  %v1155_v2 = vmul.f32 %v1147_v30, %v1147_v30 }
 0xbd8   :  { %v1160_v33 = vmul.f32 0.044715, %v1158_v32  ;;  %v1157_v34 = vmul.f32 %v1155_v2, %v1147_v30 }
 0xbda   :  { %v1162_v35 = vadd.f32 %v1160_v33, %v1152_v27  ;;  %v1159_v36 = vmul.f32 0.044715, %v1157_v34 }
 0xbdc   :  { %v1164_v37 = vmul.f32 0.7978846, %v1162_v35  ;;  %v1161_v38 = vadd.f32 %v1159_v36, %v1147_v30 }
 0xbde   :  { %3063 = vtanh.f32 %v1164_v37  ;;  %v1163_v39 = vmul.f32 0.7978846, %v1161_v38 }
 0xbe0   :  { %3065 = vtanh.f32 %v1163_v39 }
 0xbeb   :  { %v3064_v40 = vpop.eup %3063 }
 0xbec   :  { %v1168_v41 = vadd.f32 1.0, %v3064_v40 }
 0xbed   :  { %v3066_v42 = vpop.eup %3065 }
 0xbee   :  { %v1167_v43 = vadd.f32 1.0, %v3066_v42  ;;  %v1170_v44 = vmul.f32 0.5, %v1168_v41 }
 0xbf0   :  { %v1169_v45 = vmul.f32 0.5, %v1167_v43  ;;  %v1172_v47 = vmul.f32 %v1170_v44, %v1152_v27 }
 0xbf2   :  { %v1171_v46 = vmul.f32 %v1169_v45, %v1147_v30 }
 0xbf4   :  { %2897 = vmatprep.mubr.msk.f32.mxu1 %vm1186_vm4, %v1171_v46 }
 0xbf5   :  { %2898 = vmatmul.mubr.msk.f32.vlgmr.msra.gmra.mxu1 %vm1186_vm4, %v1172_v47 }
 0xcb5   :  { %v2899_v49 = vpop.f32.mrf.mxu1 }
 0xcb6   :  { %v1265_v50 = vadd.f32 %v2899_v49, %v2591_v48 }
 0xcb7   :  { %v1259_v51 = vpop.f32.mrf.mxu1 }
 0xcb8   :  { %v1260_v52 = vadd.f32 %v2591_v48, %v1259_v51  ;;  %v1269_v53 = vadd.f32 %v1265_v50, %v1064_v13 }
 0xcba   :  { %v1275_v54 = vsel %vm356_vm10, %v1269_v53, 0.0  ;;  %v1268_v16 = vadd.f32 %v1260_v52, %v3448_v11 }
 0xcbb   :  { %1276 = vadd.xlane.f32.xlu0 %v1275_v54 }
 0xcbc   :  { %v1272_v14 = vsel %vm356_vm10, %v1268_v16, 0.0 }
 0xcbd   :  { %1273 = vadd.xlane.f32.xlu1 %v1272_v14 }
 0xd44   :  { %v1277_v55 = vpop.xlane.xlu0 %1276 }
 0xd45   :  { %v1279_v56 = vmul.f32 0.03125, %v1277_v55 }
 0xd46   :  { %v1274_v57 = vpop.xlane.xlu1 %1273 }
 0xd47   :  { %v1281_v58 = vsub.f32 %v1269_v53, %v1279_v56  ;;  %v1278_v59 = vmul.f32 0.03125, %v1274_v57 }
 0xd49   :  { %v1280_v60 = vsub.f32 %v1268_v16, %v1278_v59  ;;  %v1283_v61 = vmul.f32 %v1281_v58, %v1281_v58 }
 0xd4b   :  { %v1287_v62 = vsel %vm356_vm10, %v1283_v61, 0.0  ;;  %v1282_v63 = vmul.f32 %v1280_v60, %v1280_v60 }
 0xd4c   :  { %1288 = vadd.xlane.f32.xlu0 %v1287_v62 }
 0xd4d   :  { %v1284_v0 = vsel %vm356_vm10, %v1282_v63, 0.0 }
 0xd4e   :  { %1285 = vadd.xlane.f32.xlu1 %v1284_v0 }
 0xdd5   :  { %v1289_v9 = vpop.xlane.xlu0 %1288 }
 0xdd6   :  { %v1291_v10 = vmul.f32 0.03125, %v1289_v9 }
 0xdd7   :  { %v1286_v11 = vpop.xlane.xlu1 %1285 }
 0xdd8   :  { %v1293_v12 = vadd.f32 1e-12, %v1291_v10  ;;  %v1290_v13 = vmul.f32 0.03125, %v1286_v11 }
 0xdda   :  { %3067 = vrsqrt.f32 %v1293_v12  ;;  %v1292_v15 = vadd.f32 1e-12, %v1290_v13 }
 0xddc   :  { %3069 = vrsqrt.f32 %v1292_v15 }
 0xde7   :  { %v3068_v17 = vpop.eup %3067 }
 0xde8   :  { %v1297_v19 = vmul.f32 %v3068_v17, %v1281_v58 }
 0xde9   :  { %v3070_v20 = vpop.eup %3069 }
 0xdea   :  { %v1296_v22 = vmul.f32 %v3070_v20, %v1280_v60  ;;  %v1303_v23 = vmul.f32 %v2594_v18, %v1297_v19 }
 0xdec   :  { %v1302_v25 = vmul.f32 %v2594_v18, %v1296_v22  ;;  %v3498_v27 = vadd.f32 %v2595_v24, %v1303_v23 }
 0xdee   :  { %v3496_v26 = vadd.f32 %v2595_v24, %v1302_v25 }
 0xdf0   :  { %2908 = vmatprep.mubr.msk.f32.mxu0 %vm356_vm10, %v3496_v26 }
 0xdf1   :  { %2909 = vmatmul.mubr.msk.f32.vlgmr.msra.gmra.mxu0 %vm356_vm10, %v3498_v27 }
 0xeb1   :  { %v2910_v28 = vpop.f32.mrf.mxu0 }
 0xeb2   :  { %v3504_v30 = vadd.f32 %v2910_v28, %v2600_v21  ;;  %v2617_v28 = vld [vmem:[%s3704_s5 + $0x30] sm:$0xff] }
 0xeb3   :  { %v1392_v32 = vpop.f32.mrf.mxu0 }
 0xeb4   :  { %v3506_v2 = vadd.f32 %v2600_v21, %v1392_v32  ;;  %1405 = vrot.lane.b32.xlu1 %v3504_v30, %s3173_s20  ;;  %v2618_v21 = vld [vmem:[%s3704_s5 + $0x38] sm:$0xff]  ;;  %v2615_v32 = vld [vmem:[%s3704_s5 + $0x20] sm:$0xff] }
 0xeb6   :  { %1403 = vrot.lane.b32.xlu0 %v3506_v2, %s3173_s20  ;;  %2915 = vmatprep.mubr.msk.f32.mxu0 %vm530_vm11, %v3506_v2 }
 0xeb8   :  { %1605 = vrot.lane.b32.xlu1 %v3504_v30, %s3176_s23 }
 0xeba   :  { %1599 = vrot.lane.b32.xlu0 %v3506_v2, %s3177_s24 }
 0xebc   :  { %1603 = vrot.lane.b32.xlu1 %v3506_v2, %s3176_s23 }
 0xec0   :  { %1601 = vrot.lane.b32.xlu1 %v3504_v30, %s3177_s24 }
 0xf26   :  { %v1406_v33 = vpop.permute.xlu1 %1405 }
 0xf27   :  { %2911 = vmatprep.subr.msk.mxu0 %vm530_vm11, %v1406_v33 }
 0xf28   :  { %2912 = vmatpush3.xpose.msk.msra.mxu0 %vm530_vm11, %v1406_v33  ;;  %v1404_v34 = vpop.permute.xlu0 %1403 }
 0xf29   :  { %2913 = vmatprep.subr.msk.mxu0 %vm530_vm11, %v1404_v34 }
 0xf2a   :  { %v1606_v35 = vpop.permute.xlu1 %1605 }
 0xf2c   :  { %2914 = vmatpush3.xpose.msk.msra.mxu0 %vm530_vm11, %v1404_v34  ;;  %v1600_v36 = vpop.permute.xlu0 %1599 }
 0xf2d   :  { %2925 = vmatprep.subr.msk.mxu0 %vm530_vm11, %v1606_v35 }
 0xf2e   :  { %v1604_v37 = vpop.permute.xlu1 %1603 }
 0xf2f   :  { %2916 = vmatmul.mubr.msk.f32.vlgmr.msra.gmra.mxu0 %vm530_vm11, %v3504_v30 }
 0xf30   :  { %2926 = vmatpush3.xpose.msk.msra.mxu0 %vm530_vm11, %v1606_v35  ;;  %2929 = vmatprep.mubr.msk.f32.mxu0 %vm530_vm11, %v1600_v36 }
 0xf31   :  { %2927 = vmatprep.subr.msk.mxu0 %vm530_vm11, %v1604_v37 }
 0xf32   :  { %v1602_v38 = vpop.permute.xlu1 %1601 }
 0xf34   :  { %2928 = vmatpush3.xpose.msk.msra.mxu0 %vm530_vm11, %v1604_v37 }
 0xf37   :  { %2930 = vmatmul.mubr.msk.f32.vlgmr.msra.gmra.mxu0 %vm530_vm11, %v1602_v38 }
 0xfef   :  { %v2917_v39 = vpop.f32.mrf.mxu0 }
 0xff0   :  { %v1487_v40 = vadd.f32 %v2917_v39, %v3367_v29 }
 0xff1   :  { %v1481_v41 = vpop.f32.mrf.mxu0 }
 0xff2   :  { %v1482_v42 = vadd.f32 %v1481_v41, %v3369_v31  ;;  %v1493_v43 = vsel %vm530_vm11, %v1487_v40, -inf }
 0xff3   :  { %1494 = vmax.xlane.f32.xlu1 %v1493_v43 }
 0xff4   :  { %v1490_v44 = vsel %vm530_vm11, %v1482_v42, -inf }
 0xff5   :  { %1491 = vmax.xlane.f32.xlu0 %v1490_v44 }
 0xff7   :  { %v2931_v45 = vpop.f32.mrf.mxu0 }
 0xff8   :  { %v1687_v48 = vadd.f32 %v2931_v45, %v3367_v29 }
 0xff9   :  { %v1681_v46 = vpop.f32.mrf.mxu0 }
 0xffa   :  { %v1682_v47 = vadd.f32 %v1681_v46, %v3369_v31  ;;  %v1693_v50 = vsel %vm530_vm11, %v1687_v48, -inf }
 0xffc   :  { %v1690_v49 = vsel %vm530_vm11, %v1682_v47, -inf }
 0xffd   :  { %1691 = vmax.xlane.f32.xlu0 %v1690_v49 }
0x1001   :  { %1694 = vmax.xlane.f32.xlu0 %v1693_v50 }
0x1004   :  { %1514 = vrot.lane.b32.xlu1 %v3504_v30, %s3175_s1 }
0x107c   :  { %v1495_v51 = vpop.xlane.xlu1 %1494 }
0x107d   :  { %v1497_v52 = vsub.f32 %v1487_v40, %v1495_v51  ;;  %v2619_v40 = vld [vmem:[#allocation2 + $0xb] ss:$0 sm:$0xff] }
0x107e   :  { %v1492_v53 = vpop.xlane.xlu0 %1491 }
0x107f   :  { %v1500_v54 = vmul.f32 1.442695, %v1497_v52  ;;  %v1496_v16 = vsub.f32 %v1482_v42, %v1492_v53 }
0x1080   :  { %v1515_v14 = vpop.permute.xlu1 %1514 }
0x1081   :  { %3071 = vpow2.f32 %v1500_v54  ;;  %v1498_v55 = vmul.f32 1.442695, %v1496_v16  ;;  %2918 = vmatprep.subr.mxu1 %v1515_v14 }
0x1082   :  { %2919 = vmatpush3.msra.mxu1 %v1515_v14 }
0x1083   :  { %3073 = vpow2.f32 %v1498_v55 }
0x1086   :  { %v1692_v29 = vpop.xlane.xlu0 %1691 }
0x1087   :  { %v1696_v0 = vsub.f32 %v1682_v47, %v1692_v29  ;;  %v2626_v29 = vld [vmem:[%s3705_s6 + $0x30] sm:$0xff] }
0x1089   :  { %v1698_v1 = vmul.f32 1.442695, %v1696_v0  ;;  %v2622_v0 = vld [vmem:[#allocation2 + $0xc] ss:$0 sm:$0xff] }
0x108a   :  { %v1695_v31 = vpop.xlane.xlu0 %1694 }
0x108b   :  { %v1697_v56 = vsub.f32 %v1687_v48, %v1695_v31  ;;  %v2625_v31 = vld [vmem:[%s3705_s6 + $0x28] sm:$0xff] }
0x108d   :  { %v1700_v57 = vmul.f32 1.442695, %v1697_v56  ;;  %v2624_v56 = vld [vmem:[%s3705_s6 + $0x20] sm:$0xff] }
0x108e   :  { %v3072_v58 = vpop.eup %3071 }
0x108f   :  { %3075 = vpow2.f32 %v1700_v57  ;;  %v1505_v59 = vsel %vm530_vm11, %v3072_v58, 0.0 }
0x1090   :  { %v3074_v60 = vpop.eup %3073  ;;  %1506 = vadd.xlane.f32.xlu0 %v1505_v59  ;;  %3077 = vpow2.f32 %v1698_v1 }
0x1091   :  { %v1502_v61 = vsel %vm530_vm11, %v3074_v60, 0.0 }
0x1092   :  { %1503 = vadd.xlane.f32.xlu1 %v1502_v61 }
0x109c   :  { %v3076_v62 = vpop.eup %3075 }
0x109d   :  { %v1705_v63 = vsel %vm530_vm11, %v3076_v62, 0.0  ;;  %v3078_v5 = vpop.eup %3077 }
0x109e   :  { %1706 = vadd.xlane.f32.xlu0 %v1705_v63  ;;  %v1702_v6 = vsel %vm530_vm11, %v3078_v5, 0.0 }
0x10a3   :  { %1714 = vrot.lane.b32.xlu1 %v3504_v30, %s3178_s25  ;;  %v2616_v30 = vld [vmem:[%s3704_s5 + $0x28] sm:$0xff] }
0x10b4   :  { %1512 = vrot.lane.b32.xlu0 %v3506_v2, %s3175_s1 }
0x10c7   :  { %1703 = vadd.xlane.f32.xlu1 %v1702_v6 }
0x10d8   :  { %1712 = vrot.lane.b32.xlu1 %v3506_v2, %s3178_s25  ;;  %s3181_s25 = smov [#allocation6]  }
0x10d9   :  { %s2538_s13 = sshll.u32 %s3181_s25, 4  ;;  %s2539_s13 = int_to_ptr.vmem [resolvable:$true] %s2538_s13 }
0x10da   :  { %p3126_p6 = scmp.lt.s32.totalorder %s2539_s13, %s2539_s13 }
0x1119   :  { %v1507_v8 = vpop.xlane.xlu0 %1506 }
0x111a   :  { %3079 = vrcp.f32 %v1507_v8 }
0x111b   :  { %v1504_v9 = vpop.xlane.xlu1 %1503 }
0x111c   :  { %3081 = vrcp.f32 %v1504_v9 }
0x111f   :  { %v1715_v18 = vpop.permute.xlu1 %1714 }
0x1127   :  { %v1707_v10 = vpop.xlane.xlu0 %1706  ;;  %v3080_v11 = vpop.eup %3079 }
0x1128   :  { %v1511_v17 = vmul.f32 %v3080_v11, %v3072_v58  ;;  %3083 = vrcp.f32 %v1707_v10 }
0x1129   :  { %v3082_v12 = vpop.eup %3081 }
0x112a   :  { %v1510_v13 = vmul.f32 %v3082_v12, %v3074_v60 }
0x112b   :  { %v1513_v15 = vpop.permute.xlu0 %1512 }
0x112c   :  { %2920 = vmatprep.subr.mxu1 %v1513_v15  ;;  %2922 = vmatprep.mubr.msk.f32.mxu1 %vm530_vm11, %v1510_v13  ;;  %v2638_v13 = vld [vmem:[%s3706_s7 + $0x78] sm:$0xff] }
0x112d   :  { %2921 = vmatpush3.msra.mxu1 %v1513_v15  ;;  %v2637_v15 = vld [vmem:[%s3706_s7 + $0x70] sm:$0xff] }
0x112e   :  { %2923 = vmatmul.mubr.msk.f32.vlgmr.msra.gmra.mxu1 %vm530_vm11, %v1511_v17  ;;  %2932 = vmatprep.subr.mxu1 %v1715_v18  ;;  %v2636_v17 = vld [vmem:[%s3706_s7 + $0x68] sm:$0xff] }
0x112f   :  { %2933 = vmatpush3.msra.mxu1 %v1715_v18  ;;  %v2635_v18 = vld [vmem:[%s3706_s7 + $0x60] sm:$0xff] }
0x1135   :  { %v3084_v22 = vpop.eup %3083 }
0x1136   :  { %v1711_v25 = vmul.f32 %v3084_v22, %v3076_v62  ;;  %v2632_v22 = vld [vmem:[%s3706_s7 + $0x48] sm:$0xff] }
0x1150   :  { %v1704_v19 = vpop.xlane.xlu1 %1703 }
0x1151   :  { %3085 = vrcp.f32 %v1704_v19  ;;  %v2634_v19 = vld [vmem:[%s3706_s7 + $0x58] sm:$0xff] }
0x1154   :  { %v1713_v20 = vpop.permute.xlu1 %1712 }
0x1155   :  { %2934 = vmatprep.subr.mxu1 %v1713_v20 }
0x1156   :  { %2935 = vmatpush3.msra.mxu1 %v1713_v20  ;;  %v2633_v20 = vld [vmem:[%s3706_s7 + $0x50] sm:$0xff] }
0x1157   :  { %2939 = vmatprep.subr.mxu1 %v2618_v21 }
0x115e   :  { %v3086_v23 = vpop.eup %3085 }
0x115f   :  { %v1710_v24 = vmul.f32 %v3086_v23, %v3078_v5  ;;  %v2623_v5 = vld [vmem:[#allocation2 + $0xd] ss:$0 sm:$0xff]  ;;  %v2631_v23 = vld [vmem:[%s3706_s7 + $0x40] sm:$0xff]  ;;  %s3121_s7 = scalar_lea.vmem %s2539_s13, 256 }
0x1160   :  { %p3122_p5 = scmp.ne.s32.totalorder %s2539_s13, %s3121_s7  ;;  %p3127_p7 = scmp.lt.s32.totalorder %s3121_s7, %s3121_s7 }
0x1161   :  { %2936 = vmatprep.mubr.msk.f32.mxu1 %vm530_vm11, %v1710_v24  ;;  %v2628_v24 = vld [vmem:[#allocation2 + $0xe] ss:$0 sm:$0xff] }
0x1162   :  { %2937 = vmatmul.mubr.msk.f32.vlgmr.msra.gmra.mxu1 %vm530_vm11, %v1711_v25  ;;  %p3128_p8 = por %p3127_p7, %p3126_p6 }
0x1163   :  { %2940 = vmatpush3.msra.mxu1 %v2618_v21 }
0x1164   :  { %2941 = vmatprep.subr.mxu1 %v2617_v28  ;;  %p3129_p9 = pnand %p3128_p8, %p3122_p5 }
0x1165   :  { %2942 = vmatpush3.msra.mxu1 %v2617_v28 }
0x1166   :  { %2943 = vmatprep.subr.mxu1 %v2616_v30 }
0x1167   :  { %2944 = vmatpush3.msra.mxu1 %v2616_v30 }
0x1168   :  { %2945 = vmatprep.subr.mxu1 %v2615_v32 }
0x1169   :  { %2946 = vmatpush3.msra.mxu1 %v2615_v32 }
0x116a   :  { %2961 = vmatprep.subr.mxu1 %v2638_v13 }
0x11ee   :  { %v2924_v2 = vpop.f32.mrf.mxu1 }
0x11f0   :  { %v1590_v33 = vpop.f32.mrf.mxu1 }
0x1222   :  { %v2938_v34 = vpop.f32.mrf.mxu1 }
0x1223   :  { %1803 = vrot.lane.b32.xlu1 %v2938_v34, %s3179_s12 }
0x1224   :  { %v1790_v35 = vpop.f32.mrf.mxu1 }
0x1225   :  { %1801 = vrot.lane.b32.xlu0 %v1790_v35, %s3179_s12 }
0x1295   :  { %v1804_v36 = vpop.permute.xlu1 %1803 }
0x1296   :  { %v1808_v39 = vsel %vm530_vm11, %v2924_v2, %v1804_v36 }
0x1297   :  { %v1802_v37 = vpop.permute.xlu0 %1801 }
0x1298   :  { %v1807_v38 = vsel %vm530_vm11, %v1590_v33, %v1802_v37 }
0x1299   :  { %2947 = vmatprep.mubr.msk.f32.mxu1 %vm356_vm10, %v1807_v38 }
0x129a   :  { %2948 = vmatmul.mubr.msk.f32.vlgmr.msra.gmra.mxu1 %vm356_vm10, %v1808_v39 }
0x129b   :  { %2962 = vmatpush3.msra.mxu1 %v2638_v13  ;;  %v2642_v13 = vld [vmem:[#allocation2 + $0x10] ss:$0 sm:$0xff] }
0x129c   :  { %2963 = vmatprep.subr.mxu1 %v2637_v15 }
0x129d   :  { %2964 = vmatpush3.msra.mxu1 %v2637_v15 }
0x129e   :  { %2965 = vmatprep.subr.mxu1 %v2636_v17 }
0x129f   :  { %2966 = vmatpush3.msra.mxu1 %v2636_v17 }
0x12a0   :  { %2967 = vmatprep.subr.mxu1 %v2635_v18 }
0x12a1   :  { %2968 = vmatpush3.msra.mxu1 %v2635_v18 }
0x12a2   :  { %2969 = vmatprep.subr.mxu1 %v2634_v19 }
0x12a3   :  { %2970 = vmatpush3.msra.mxu1 %v2634_v19 }
0x12a4   :  { %2971 = vmatprep.subr.mxu1 %v2633_v20 }
0x12a5   :  { %2972 = vmatpush3.msra.mxu1 %v2633_v20  ;;  %v2280_v20 = vmul.u32 8, %v3247_v4  ;;  %v2360_v4 = vld [vmem:[%s3707_s8 + $0x18] sm:$0xff] }
0x12a6   :  { %2973 = vmatprep.subr.mxu1 %v2632_v22 }
0x12a7   :  { %2974 = vmatpush3.msra.mxu1 %v2632_v22  ;;  %v2643_v22 = vld [vmem:[#allocation2 + $0x11] ss:$0 sm:$0xff]  ;;  %vm2281_vm6 = vcmp.eq.s32.totalorder %v3245_v3, %v2280_v20 }
0x12a8   :  { %2975 = vmatprep.subr.mxu1 %v2631_v23  ;;  %v2359_v3 = vld [vmem:[%s3707_s8 + $0x10] sm:$0xff] }
0x12a9   :  { %2976 = vmatpush3.msra.mxu1 %v2631_v23 }
0x12aa   :  { %3009 = vmatprep.subr.mxu1 %v3172_v7 }
0x135a   :  { %v2949_v41 = vpop.f32.mrf.mxu1 }
0x135b   :  { %v1897_v42 = vadd.f32 %v2949_v41, %v2619_v40 }
0x135c   :  { %v1891_v43 = vpop.f32.mrf.mxu1 }
0x135d   :  { %v1892_v44 = vadd.f32 %v2619_v40, %v1891_v43  ;;  %v1901_v45 = vadd.f32 %v1897_v42, %v3498_v27 }
0x135f   :  { %v1907_v46 = vsel %vm356_vm10, %v1901_v45, 0.0  ;;  %v1900_v47 = vadd.f32 %v1892_v44, %v3496_v26  ;;  %v2627_v26 = vld [vmem:[%s3705_s6 + $0x38] sm:$0xff] }
0x1360   :  { %1908 = vadd.xlane.f32.xlu1 %v1907_v46  ;;  %2950 = vmatprep.subr.mxu0 %v2627_v26 }
0x1361   :  { %v1904_v48 = vsel %vm356_vm10, %v1900_v47, 0.0  ;;  %2951 = vmatpush3.msra.mxu0 %v2627_v26 }
0x1362   :  { %1905 = vadd.xlane.f32.xlu0 %v1904_v48  ;;  %2952 = vmatprep.subr.mxu0 %v2626_v29 }
0x1363   :  { %2953 = vmatpush3.msra.mxu0 %v2626_v29 }
0x1364   :  { %2954 = vmatprep.subr.mxu0 %v2625_v31 }
0x1365   :  { %2955 = vmatpush3.msra.mxu0 %v2625_v31 }
0x1366   :  { %2956 = vmatprep.subr.mxu0 %v2624_v56 }
0x1367   :  { %2957 = vmatpush3.msra.mxu0 %v2624_v56 }
0x13e9   :  { %v1909_v49 = vpop.xlane.xlu1 %1908 }
0x13ea   :  { %v1911_v50 = vmul.f32 0.03125, %v1909_v49  ;;  %v2639_v49 = vld [vmem:[#allocation2 + $0xf] ss:$0 sm:$0xff] }
0x13eb   :  { %v1906_v51 = vpop.xlane.xlu0 %1905 }
0x13ec   :  { %v1910_v52 = vmul.f32 0.03125, %v1906_v51  ;;  %v1913_v53 = vsub.f32 %v1901_v45, %v1911_v50 }
0x13ee   :  { %v1912_v54 = vsub.f32 %v1900_v47, %v1910_v52  ;;  %v1915_v55 = vmul.f32 %v1913_v53, %v1913_v53 }
0x13f0   :  { %v1914_v16 = vmul.f32 %v1912_v54, %v1912_v54  ;;  %v1919_v27 = vsel %vm356_vm10, %v1915_v55, 0.0 }
0x13f2   :  { %v1916_v14 = vsel %vm356_vm10, %v1914_v16, 0.0 }
0x13f3   :  { %1917 = vadd.xlane.f32.xlu0 %v1916_v14 }
0x13f7   :  { %1920 = vadd.xlane.f32.xlu0 %v1919_v27 }
0x147c   :  { %v1918_v57 = vpop.xlane.xlu0 %1917 }
0x147d   :  { %v1922_v58 = vmul.f32 0.03125, %v1918_v57 }
0x147f   :  { %v1924_v59 = vadd.f32 1e-12, %v1922_v58 }
0x1480   :  { %v1921_v60 = vpop.xlane.xlu0 %1920 }
0x1481   :  { %3087 = vrsqrt.f32 %v1924_v59  ;;  %v1923_v61 = vmul.f32 0.03125, %v1921_v60 }
0x1483   :  { %v1925_v62 = vadd.f32 1e-12, %v1923_v61 }
0x1485   :  { %3089 = vrsqrt.f32 %v1925_v62  ;;  %v2191_v62 = vld [vmem:[%s3707_s8 + $0x58] sm:$0xff] }
0x1486   :  { %2980 = vmatprep.subr.mxu0 %v2191_v62 }
0x148e   :  { %v3088_v63 = vpop.eup %3087 }
0x148f   :  { %v1928_v1 = vmul.f32 %v3088_v63, %v1912_v54  ;;  %v2190_v63 = vld [vmem:[%s3707_s8 + $0x50] sm:$0xff] }
0x1491   :  { %v1934_v6 = vmul.f32 %v2622_v0, %v1928_v1  ;;  %v2188_v1 = vld [vmem:[%s3707_s8 + $0x40] sm:$0xff] }
0x1492   :  { %v3090_v8 = vpop.eup %3089 }
0x1493   :  { %v1929_v9 = vmul.f32 %v3090_v8, %v1913_v53  ;;  %v3594_v10 = vadd.f32 %v2623_v5, %v1934_v6 }
0x1495   :  { %v1935_v11 = vmul.f32 %v2622_v0, %v1929_v9  ;;  %2958 = vmatprep.mubr.msk.f32.mxu0 %vm356_vm10, %v3594_v10  ;;  %v2189_v0 = vld [vmem:[%s3707_s8 + $0x48] sm:$0xff] }
0x1497   :  { %v1941_v12 = vadd.f32 %v2623_v5, %v1935_v11 }
0x1499   :  { %2959 = vmatmul.mubr.msk.f32.vlgmr.msra.gmra.mxu0 %vm356_vm10, %v1941_v12 }
0x149a   :  { %2981 = vmatpush3.msra.mxu0 %v2191_v62 }
0x149b   :  { %2982 = vmatprep.subr.mxu0 %v2190_v63 }
0x149c   :  { %2983 = vmatpush3.msra.mxu0 %v2190_v63 }
0x149d   :  { %2984 = vmatprep.subr.mxu0 %v2189_v0 }
0x149e   :  { %2985 = vmatpush3.msra.mxu0 %v2189_v0 }
0x149f   :  { %2986 = vmatprep.subr.mxu0 %v2188_v1 }
0x14a0   :  { %2987 = vmatpush3.msra.mxu0 %v2188_v1 }
0x14a1   :  { %2991 = vmatprep.subr.mxu0 %v3172_v7 }
0x1559   :  { %v2960_v25 = vpop.f32.mrf.mxu0 }
0x155a   :  { %v2030_v21 = vadd.f32 %v2960_v25, %v2628_v24 }
0x155b   :  { %v2024_v28 = vpop.f32.mrf.mxu0 }
0x155c   :  { %v2034_v30 = vmul.f32 %v2030_v21, %v2030_v21  ;;  %v2025_v32 = vadd.f32 %v2628_v24, %v2024_v28  ;;  %v2358_v28 = vld [vmem:[%s3707_s8 + $0x8] sm:$0xff] }
0x155e   :  { %v2036_v2 = vmul.f32 %v2034_v30, %v2030_v21  ;;  %v2033_v33 = vmul.f32 %v2025_v32, %v2025_v32  ;;  %v2357_v30 = vld [vmem:[%s3707_s8] sm:$0xff] }
0x1560   :  { %v2038_v34 = vmul.f32 0.044715, %v2036_v2  ;;  %v2035_v35 = vmul.f32 %v2033_v33, %v2025_v32 }
0x1562   :  { %v2040_v36 = vadd.f32 %v2038_v34, %v2030_v21  ;;  %v2037_v37 = vmul.f32 0.044715, %v2035_v35 }
0x1564   :  { %v2042_v38 = vmul.f32 0.7978846, %v2040_v36  ;;  %v2039_v39 = vadd.f32 %v2037_v37, %v2025_v32 }
0x1566   :  { %3091 = vtanh.f32 %v2042_v38  ;;  %v2041_v40 = vmul.f32 0.7978846, %v2039_v39  ;;  %v2443_v38 = vld [vmem:[%s3707_s8 + $0x38] sm:$0xff]  ;;  %v2442_v39 = vld [vmem:[%s3707_s8 + $0x30] sm:$0xff] }
0x1568   :  { %3093 = vtanh.f32 %v2041_v40  ;;  %v2441_v40 = vld [vmem:[%s3707_s8 + $0x28] sm:$0xff] }
0x1573   :  { %v3092_v41 = vpop.eup %3091 }
0x1574   :  { %v2046_v42 = vadd.f32 1.0, %v3092_v41  ;;  %v2440_v41 = vld [vmem:[%s3707_s8 + $0x20] sm:$0xff] }
0x1575   :  { %v3094_v43 = vpop.eup %3093 }
0x1576   :  { %v2045_v44 = vadd.f32 1.0, %v3094_v43  ;;  %v2048_v45 = vmul.f32 0.5, %v2046_v42  ;;  %v2649_v42 = vld [vmem:[#allocation2 + $0x12] ss:$0 sm:$0xff] }
0x1578   :  { %v2047_v46 = vmul.f32 0.5, %v2045_v44  ;;  %v2050_v48 = vmul.f32 %v2048_v45, %v2030_v21  ;;  %v2647_v21 = vsel %vm2281_vm6, 1.0, %v3172_v7 }
0x157a   :  { %v2049_v47 = vmul.f32 %v2047_v46, %v2025_v32  ;;  %v2644_v32 = vld [vmem:[#allocation2 + $0x14] ss:$0 sm:$0xff] }
0x157c   :  { %2977 = vmatprep.mubr.msk.f32.mxu1 %vm1186_vm4, %v2049_v47 }
0x157d   :  { %2978 = vmatmul.mubr.msk.f32.vlgmr.msra.gmra.mxu1 %vm1186_vm4, %v2050_v48 }
0x157e   :  { %3017 = vmatprep.mubr.msk.f32.mxu1 %vm3180_vm5, %v3172_v7  ;;  %3010 = vmatpush3.msra.mxu1 %v2443_v38 }
0x157f   :  { %3011 = vmatprep.subr.mxu1 %v3172_v7 }
0x1580   :  { %3012 = vmatpush3.msra.mxu1 %v2442_v39 }
0x1581   :  { %3013 = vmatprep.subr.mxu1 %v3172_v7 }
0x1582   :  { %3014 = vmatpush3.msra.mxu1 %v2441_v40 }
0x1583   :  { %3015 = vmatprep.subr.mxu1 %v3172_v7 }
0x1584   :  { %3016 = vmatpush3.msra.mxu1 %v2440_v41 }
0x163d   :  { %v2979_v50 = vpop.f32.mrf.mxu1 }
0x163e   :  { %v2143_v51 = vadd.f32 %v2979_v50, %v2639_v49 }
0x163f   :  { %v2137_v52 = vpop.f32.mrf.mxu1 }
0x1640   :  { %v2138_v53 = vadd.f32 %v2639_v49, %v2137_v52  ;;  %v2147_v54 = vadd.f32 %v2143_v51, %v1941_v12 }
0x1642   :  { %v2153_v16 = vsel %vm356_vm10, %v2147_v54, 0.0  ;;  %v2146_v14 = vadd.f32 %v2138_v53, %v3594_v10 }
0x1643   :  { %2154 = vadd.xlane.f32.xlu0 %v2153_v16 }
0x1644   :  { %v2150_v55 = vsel %vm356_vm10, %v2146_v14, 0.0 }
0x1645   :  { %2151 = vadd.xlane.f32.xlu1 %v2150_v55 }
0x16cc   :  { %v2155_v27 = vpop.xlane.xlu0 %2154 }
0x16cd   :  { %v2157_v26 = vmul.f32 0.03125, %v2155_v27 }
0x16ce   :  { %v2152_v29 = vpop.xlane.xlu1 %2151 }
0x16cf   :  { %v2159_v31 = vsub.f32 %v2147_v54, %v2157_v26  ;;  %v2156_v56 = vmul.f32 0.03125, %v2152_v29 }
0x16d1   :  { %v2158_v57 = vsub.f32 %v2146_v14, %v2156_v56  ;;  %v2161_v58 = vmul.f32 %v2159_v31, %v2159_v31 }
0x16d3   :  { %v2165_v59 = vsel %vm356_vm10, %v2161_v58, 0.0  ;;  %v2160_v60 = vmul.f32 %v2158_v57, %v2158_v57 }
0x16d4   :  { %2166 = vadd.xlane.f32.xlu0 %v2165_v59 }
0x16d5   :  { %v2162_v61 = vsel %vm356_vm10, %v2160_v60, 0.0 }
0x16d6   :  { %2163 = vadd.xlane.f32.xlu1 %v2162_v61 }
0x175d   :  { %v2167_v5 = vpop.xlane.xlu0 %2166 }
0x175e   :  { %v2169_v6 = vmul.f32 0.03125, %v2167_v5 }
0x175f   :  { %v2164_v8 = vpop.xlane.xlu1 %2163 }
0x1760   :  { %v2171_v9 = vadd.f32 1e-12, %v2169_v6  ;;  %v2168_v10 = vmul.f32 0.03125, %v2164_v8 }
0x1762   :  { %3095 = vrsqrt.f32 %v2171_v9  ;;  %v2170_v11 = vadd.f32 1e-12, %v2168_v10 }
0x1764   :  { %3097 = vrsqrt.f32 %v2170_v11 }
0x176f   :  { %v3096_v12 = vpop.eup %3095 }
0x1770   :  { %v2175_v15 = vmul.f32 %v3096_v12, %v2159_v31 }
0x1771   :  { %v3098_v17 = vpop.eup %3097 }
0x1772   :  { %v2174_v18 = vmul.f32 %v3098_v17, %v2158_v57  ;;  %v2181_v19 = vmul.f32 %v2642_v13, %v2175_v15 }
0x1774   :  { %v2180_v23 = vmul.f32 %v2642_v13, %v2174_v18  ;;  %v2187_v25 = vadd.f32 %v2643_v22, %v2181_v19 }
0x1776   :  { %v2186_v24 = vadd.f32 %v2643_v22, %v2180_v23 }
0x1778   :  { %2988 = vmatprep.mubr.msk.f32.mxu0 %vm356_vm10, %v2186_v24 }
0x1779   :  { %2989 = vmatmul.mubr.msk.f32.vlgmr.msra.gmra.mxu0 %vm356_vm10, %v2187_v25 }
0x177a   :  { %2992 = vmatpush3.msra.mxu0 %v2187_v25  ;;  %2995 = vmatprep.mubr.msk.f32.mxu0 %vm3180_vm5, %v3172_v7 }
0x177b   :  { %2993 = vmatprep.subr.mxu0 %v3172_v7 }
0x177c   :  { %2994 = vmatpush3.msra.mxu0 %v2186_v24 }
0x177d   :  { %2996 = vmatmul.mubr.msk.f32.vlgmr.msra.gmra.mxu0 %vm530_vm11, %v2647_v21  ;;  %2998 = vmatprep.subr.mxu0 %v3172_v7 }
0x177e   :  { %2999 = vmatpush3.msra.mxu0 %v2360_v4  ;;  %3006 = vmatprep.mubr.msk.f32.mxu0 %vm3180_vm5, %v3172_v7 }
0x177f   :  { %3000 = vmatprep.subr.mxu0 %v3172_v7 }
0x1780   :  { %3001 = vmatpush3.msra.mxu0 %v2359_v3 }
0x1781   :  { %3002 = vmatprep.subr.mxu0 %v3172_v7 }
0x1782   :  { %3003 = vmatpush3.msra.mxu0 %v2358_v28 }
0x1783   :  { %3004 = vmatprep.subr.mxu0 %v3172_v7 }
0x1784   :  { %3005 = vmatpush3.msra.mxu0 %v2357_v30 }
0x1839   :  { %v2990_v2 = vpop.f32.mrf.mxu0 }
0x183a   :  { %v2275_v33 = vadd.f32 %v2990_v2, %v2644_v32 }
0x183b   :  { %v2269_v34 = vpop.f32.mrf.mxu0 }
0x183c   :  { %2279 = vst [vmem:[#allocation6 + $0x8] sm:$0xff] %v2275_v33  ;;  %v2270_v35 = vadd.f32 %v2644_v32, %v2269_v34 }
0x183d   :  { %v2353_v36 = vpop.f32.mrf.mxu0 }
0x183e   :  { %2278 = vst [vmem:[#allocation6] sm:$0xff] %v2270_v35  ;;  %3007 = vmatmul.mubr.msk.f32.vlgmr.msra.gmra.mxu0 %vm356_vm10, %v2353_v36 }
0x183f   :  { %v2997_v37 = vpop.f32.mrf.mxu0 }
0x18fe   :  { %v2435_v43 = vpop.f32.mrf.mxu0 }
0x18ff   :  { %v2436_v44 = vadd.f32 %v2649_v42, %v2435_v43 }
0x1900   :  { %v3008_v45 = vpop.f32.mrf.mxu0 }
0x1901   :  { %3099 = vtanh.f32 %v2436_v44 }
0x190e   :  { %v3100_v46 = vpop.eup %3099 }
0x190f   :  { %3018 = vmatmul.mubr.msk.f32.vlgmr.msra.gmra.mxu1 %vm356_vm10, %v3100_v46 }
0x1910   :  { %3132 = shalt.err (!%p3129_p9)
}
0x1911   :  { %2544 = dma.vmem_to_hbm [thread:$0]  %s2539_s13, 256, %s3709_s10, [#allocation7], %s3168_s16, %s3168_s16, %s3169_s17   ;;  %v2651_v7 = vld [vmem:[#allocation2 + $0x13] ss:$0 sm:$0xff] }
0x1912   :  { %s3182_s5 = smov [#allocation5]  }
0x1913   :  { %s2529_s12 = sshll.u32 %s3182_s5, 4  ;;  %s2530_s12 = int_to_ptr.vmem [resolvable:$true] %s2529_s12 }
0x1914   :  { %s3141_s15 = scalar_lea.vmem %s2530_s12, 32  ;;  %p3146_p11 = scmp.lt.s32.totalorder %s2530_s12, %s2530_s12 }
0x1915   :  { %p3142_p10 = scmp.ne.s32.totalorder %s2530_s12, %s3141_s15  ;;  %p3147_p12 = scmp.lt.s32.totalorder %s3141_s15, %s3141_s15 }
0x1917   :  { %p3148_p13 = por %p3147_p12, %p3146_p11 }
0x1919   :  { %p3149_p0 = pnand %p3148_p13, %p3142_p10 }
0x19cf   :  { %v2518_v47 = vpop.f32.mrf.mxu1 }
0x19d0   :  { %v2519_v48 = vadd.f32 %v2651_v7, %v2518_v47 }
0x19d1   :  { %v3019_v49 = vpop.f32.mrf.mxu1 }
0x19d2   :  { %2522 = vst [vmem:[#allocation5] sm:$0x3] %v2519_v48 }
0x19d3   :  { %3152 = shalt.err (!%p3149_p0)
}
0x19d4   :  { %2532 = dma.vmem_to_hbm [thread:$0]  %s2530_s12, 32, %s3708_s9, [#allocation4]  }
0x19d5   :  { %3163 = dma.done.wait [#allocation4], 32  }
0x19d6   :  { %3164 = vsyncadd [#allocation4], 4294967264 }
0x19d7   :  { %3165 = dma.done.wait [#allocation7], 256  }
0x19d8   :  { %3166 = vsyncadd [#allocation7], 4294967040 }
0x19d9   :  { %2551 = vsyncpa [#allocation3], 1 }
0x19da   :  { %2552 = vsyncpa [#allocation4], 1 }
0x19db   :  { %2553 = vsyncpa [#allocation7], 1 }

</bundles_post_ra>
